<compile_context>
chip_gen: v7x
topology: tpu7x:2x2x1
jax: 0.10.0
libtpu: 0.0.40
codegen_flags: <defaults>
</compile_context>

<pallas_src>
import functools
import math
from math import factorial

import numpy as np
import jax
import jax.numpy as jnp
from jax import lax
from jax.experimental import pallas as pl
from jax.experimental.pallas import tpu as pltpu


LANE = 128
CHUNK_SUB = 16                 # sublanes per in-kernel chunk (native bf16 tile)
CHUNK = CHUNK_SUB * LANE       # 2048 samples per (16, 128) chunk


def _sh_norm_consts(L):
    """Python-float normalization constants norm[l][m] (trace-time)."""
    norm = [[0.0] * (L + 1) for _ in range(L + 1)]
    for l in range(L + 1):
        for m in range(l + 1):
            norm[l][m] = math.sqrt(
                (2 * l + 1) / (4 * math.pi) * factorial(l - m) / factorial(l + m)
            )
    return norm


def _sh_embed_kernel(dirs_ref, coefs_ref, out_ref, *, L, n_chunks):
    """dirs_ref : (3,    NC, 16, 128) f32   rows = x / y / z ray components
       coefs_ref: (3*K,  NC, 16, 128) bf16  row index = channel*K + sh_index
       out_ref  : (3,    NC, 16, 128) f32   rgb rows
       NC = chunks per grid step; batch occupies the (16,128) tile."""
    K = (L + 1) * (L + 1)
    norm = _sh_norm_consts(L)
    sqrt2 = math.sqrt(2.0)

    @pl.loop(0, n_chunks)
    def _chunk(c):
        xd = dirs_ref[0, c]                     # (16, 128) full-tile loads
        yd = dirs_ref[1, c]
        zd = dirs_ref[2, c]

        # cos(theta)/sin(theta) via EUP rsqrt (no VALU sqrt/div chain).
        ct = jnp.clip(zd * lax.rsqrt(xd * xd + yd * yd + zd * zd + 1e-24),
                      -1.0, 1.0)
        st = jnp.sqrt(jnp.maximum(1.0 - ct * ct, 1e-14))

        # cos(phi)/sin(phi) via rsqrt; equals x/rho, y/rho away from the pole.
        inv_rho = lax.rsqrt(xd * xd + yd * yd + 1e-20)
        cphi = xd * inv_rho
        sphi = yd * inv_rho

        # cos(m*phi), sin(m*phi) by angle-addition recurrence (no in-kernel trig).
        cos_m = [jnp.ones_like(cphi)]
        sin_m = [jnp.zeros_like(sphi)]
        for _m in range(1, L + 1):
            c_prev, s_prev = cos_m[-1], sin_m[-1]
            cos_m.append(c_prev * cphi - s_prev * sphi)
            sin_m.append(s_prev * cphi + c_prev * sphi)

        # Fused MAC: fold each SH basis row into the RGB accumulators as soon
        # as it is produced; all K rows are never materialized.  One
        # accumulator per channel (serial add chain is filler under the DMA).
        acc = [None, None, None]

        def add_row(idx, row):
            for ch in range(3):
                coef = coefs_ref[ch * K + idx, c].astype(jnp.float32)  # bf16->f32
                term = row * coef
                acc[ch] = term if acc[ch] is None else acc[ch] + term

        # l = 0 : P_0^0 == 1 folded into the constant.
        add_row(0, norm[0][0])

        # Associated Legendre recurrence; only two previous levels kept live.
        p_prev2 = {}
        p_prev1 = {0: jnp.ones_like(ct)}          # P_0^0
        for l in range(1, L + 1):
            p_cur = {l: (2 * l - 1) * st * p_prev1[l - 1]}
            for m in range(l - 1, -1, -1):
                a = (2 * l - 1) * ct * p_prev1[m]
                if m <= l - 2:
                    p_cur[m] = (a - (l + m - 1) * p_prev2[m]) * (1.0 / (l - m))
                else:
                    p_cur[m] = a * (1.0 / (l - m))
            base0 = l * l + l
            add_row(base0, norm[l][0] * p_cur[0])             # m = 0
            for m in range(1, l + 1):
                s_const = sqrt2 * ((-1.0) ** m) * norm[l][m]
                pm = p_cur[m]
                add_row(base0 + m, s_const * pm * cos_m[m])   # m > 0
                add_row(base0 - m, s_const * pm * sin_m[m])   # m < 0
            p_prev2, p_prev1 = p_prev1, p_cur

        for ch in range(3):
            out_ref[ch, c] = jnp.clip(acc[ch], 0.0, 1.0)      # lane-dense store


def prepare_sh_table(sh_data, coef_dtype=jnp.bfloat16):
    """One-time re-layout + quantization of the pre-baked SH grid ('init'):
    (RES_Y, RES_X, K, 3) -> (RES_Y*RES_X, 3*K), last dim channel-major
    (index = c*K + k), stored in bf16 to halve the dominant HBM stream."""
    ry, rx, K, _ = sh_data.shape
    return (jnp.transpose(jnp.asarray(sh_data, jnp.float32), (0, 1, 3, 2))
            .reshape(ry * rx, 3 * K).astype(coef_dtype))


def make_sh_embed(sh_data, L, *, tile_b=32 * 1024, coef_dtype=jnp.bfloat16):
    """Returns a jitted forward(y, x, ray_dir) -> (B, 3), equiv. SHEmbed.forward."""
    res_y, res_x = int(sh_data.shape[0]), int(sh_data.shape[1])
    K = (L + 1) * (L + 1)
    assert sh_data.shape[2] == K and sh_data.shape[3] == 3
    sh_flat = prepare_sh_table(sh_data, coef_dtype)      # (res_y*res_x, 3K) bf16
    coef_bytes = jnp.dtype(coef_dtype).itemsize

    # Cap the per-step block so double-buffered blocks stay inside the 16 MiB
    # v5e default scoped-VMEM limit (v6e/v7x defaults are 32 MiB).
    chunk_block_bytes = (3 * K * coef_bytes + 3 * 4 + 3 * 4) * CHUNK
    vmem_cap_chunks = max(1, (12 * 1024 * 1024) // (2 * chunk_block_bytes))
    max_nc_tile = max(1, min(tile_b // CHUNK, vmem_cap_chunks))

    @jax.jit
    def forward(y, x, ray_dir):
        B = y.shape[0]
        # ---- static tiling (trace time): big tiles amortize the ~0.35 us
        #      per-grid-step cost; even step count keeps both v7x TCs busy. ----
        nc_total = max(1, -(-B // CHUNK))                # 2048-sample chunks
        n_steps = -(-nc_total // max_nc_tile)
        if nc_total >= 2:
            n_steps = max(2, n_steps)
            n_steps += n_steps % 2                       # even for 2 v7x TCs
        nc_tile = -(-nc_total // n_steps)
        Bp = n_steps * nc_tile * CHUNK

        # ---- safe_px + flat pixel index (pad with 0: valid, sliced off later) ----
        yi = jnp.clip(jnp.round(y), 0, res_y - 1).astype(jnp.int32)
        xi = jnp.clip(jnp.round(x), 0, res_x - 1).astype(jnp.int32)
        idx = jnp.pad(yi * res_x + xi, (0, Bp - B))

        # ---- gather contiguous 3K rows (kernel (c,k) order); allow_input_fusion
        #      lets XLA fold this gather+transpose into the kernel's coef input. ----
        coefs_rows = jnp.take(sh_flat, idx, axis=0)              # (Bp, 3K) bf16
        coefs_t = coefs_rows.T.reshape(3 * K, Bp // CHUNK, CHUNK_SUB, LANE)

        # ---- ray dirs: pad tail with (0,0,1) so rsqrt math stays finite on pads ----
        d = ray_dir.astype(jnp.float32)
        pad = jnp.broadcast_to(jnp.asarray([0.0, 0.0, 1.0], jnp.float32),
                               (Bp - B, 3))
        dirs_t = jnp.concatenate([d, pad], axis=0).T.reshape(
            3, Bp // CHUNK, CHUNK_SUB, LANE)

        cost = pl.CostEstimate(
            flops=int(Bp * (8 * 3 * K + 64)),
            transcendentals=int(3 * Bp),
            bytes_accessed=int(Bp * (3 * K * coef_bytes + 12 + 12)))

        out = pl.pallas_call(
            functools.partial(_sh_embed_kernel, L=L, n_chunks=nc_tile),
            out_shape=jax.ShapeDtypeStruct((3, Bp // CHUNK, CHUNK_SUB, LANE),
                                           jnp.float32),
            grid=(n_steps,),
            in_specs=[
                pl.BlockSpec((3, nc_tile, CHUNK_SUB, LANE),
                             lambda b: (0, b, 0, 0)),
                pl.BlockSpec((3 * K, nc_tile, CHUNK_SUB, LANE),
                             lambda b: (0, b, 0, 0)),
            ],
            out_specs=pl.BlockSpec((3, nc_tile, CHUNK_SUB, LANE),
                                   lambda b: (0, b, 0, 0)),
            compiler_params=pltpu.CompilerParams(
                dimension_semantics=("parallel",),
                allow_input_fusion=[False, True]),       # dirs: no, coefs: yes
            cost_estimate=cost,
        )(dirs_t, coefs_t)

        return out.reshape(3, Bp)[:, :B].T               # (B, 3)

    return forward


def _reference_forward(sh_np, L, y_np, x_np, dirs_np):
    """Pure numpy reference mirroring the PyTorch code (acos/atan2/cos/sin path)."""
    res_y, res_x = sh_np.shape[0], sh_np.shape[1]
    yi = np.clip(np.rint(y_np), 0, res_y - 1).astype(np.int64)
    xi = np.clip(np.rint(x_np), 0, res_x - 1).astype(np.int64)
    coefs = sh_np[yi, xi].astype(np.float64)               # (B, K, 3)

    d = dirs_np.astype(np.float64)
    N = d.shape[0]
    r = np.linalg.norm(d, axis=-1) + 1e-14
    xd, yd, zd = d[:, 0], d[:, 1], d[:, 2]
    theta = np.arccos(np.clip(zd / r, -1, 1))
    phi = np.arctan2(yd, xd)
    ct = np.cos(theta)

    p = np.zeros((L + 1, L + 1, N), np.float64)
    p[0, 0] = 1.0
    if L >= 1:
        p[1, 0] = ct
        sy = np.sqrt(np.maximum(1 - ct * ct, 1e-14))
        p[1, 1] = sy
        for l in range(2, L + 1):
            p[l, l] = (2 * l - 1) * sy * p[l - 1, l - 1]
            for m in range(l - 1, -1, -1):
                a = (2 * l - 1) * ct * p[l - 1, m]
                b = (l + m - 1) * p[l - 2, m] if l - 2 >= 0 else 0.0
                p[l, m] = (a - b) / (l - m)

    K = (L + 1) * (L + 1)
    norm = _sh_norm_consts(L)
    B_mat = np.zeros((N, K), np.float64)
    for l in range(L + 1):
        for m in range(-l, l + 1):
            idx = l * l + l + m
            if m == 0:
                B_mat[:, idx] = norm[l][0] * p[l, 0]
            elif m > 0:
                B_mat[:, idx] = (math.sqrt(2.0) * ((-1) ** m) * norm[l][m]
                                 * p[l, m] * np.cos(m * phi))
            else:
                mp = -m
                B_mat[:, idx] = (math.sqrt(2.0) * ((-1) ** m) * norm[l][mp]
                                 * p[l, mp] * np.sin(mp * phi))
    color = np.einsum('bi,bij->bj', B_mat, coefs)
    return np.clip(color, 0.0, 1.0)


if __name__ == "__main__":
    # Deterministic synthetic parameters (stand-in for the pre-baked SH grid).
    L = 3
    K = (L + 1) * (L + 1)      # 16
    RES_D = 32                 # small stand-in for RES=512

    key = jax.random.PRNGKey(0)
    k_sh, k_rest = jax.random.split(key)
    sh_data = jax.random.uniform(k_sh, (RES_D, RES_D, K, 3), jnp.float32)

    fwd = make_sh_embed(sh_data, L)   # defaults: bf16 table, big (16-chunk) tiles

    # Reference uses the same bf16-quantized table so only the SH-basis math
    # (trig-free, epsilon placement) and f32 accumulation differ.
    sh_q = np.asarray(sh_data.astype(jnp.bfloat16).astype(jnp.float32))

    for B in (8, 2500, 5000):   # tiny batch, 2-step grid, 2-step x 2-chunk grid
        kb = jax.random.fold_in(k_rest, B)
        ky, kx, kd = jax.random.split(kb, 3)
        y = jax.random.uniform(ky, (B,), jnp.float32, 0.0, RES_D - 1.0)
        x = jax.random.uniform(kx, (B,), jnp.float32, 0.0, RES_D - 1.0)
        ray_dir = jax.random.normal(kd, (B, 3), jnp.float32)

        color = jax.block_until_ready(fwd(y, x, ray_dir))
        assert color.shape == (B, 3) and color.dtype == jnp.float32

        ref = _reference_forward(sh_q, L, np.asarray(y), np.asarray(x),
                                 np.asarray(ray_dir))
        np.testing.assert_allclose(np.asarray(color), ref, rtol=5e-4, atol=5e-4)

    print("KERNEL_OK")
</pallas_src>

<mosaic_0001>
module attributes {stable_mosaic.version = 11 : i64} {
  func.func @_sh_embed_kernel(%arg0: i32, %arg1: memref<3x1x16x128xf32, #tpu.memory_space<vmem>>, %arg2: memref<48x1x16x128xbf16, #tpu.memory_space<vmem>>, %arg3: memref<3x1x16x128xf32, #tpu.memory_space<vmem>>) attributes {dimension_semantics = [#tpu.dimension_semantics<parallel>], iteration_bounds = array<i64: 1>, scalar_prefetch = 0 : i64, scratch_operands = 0 : i64, tpu.core_type = #tpu.core_type<tc>, window_params = [{transform_indices = @transform_0, window_bounds = array<i64: 3, 1, 16, 128>}, {transform_indices = @transform_1, window_bounds = array<i64: 48, 1, 16, 128>}, {transform_indices = @transform_2, window_bounds = array<i64: 3, 1, 16, 128>}]} {
    %c0_i32 = arith.constant 0 : i32
    %c1_i32 = arith.constant 1 : i32
    %0 = arith.muli %c0_i32, %c1_i32 : i32
    %c0_i32_0 = arith.constant 0 : i32
    %1 = arith.addi %c0_i32_0, %0 : i32
    %c0 = arith.constant 0 : index
    %2 = arith.index_cast %1 : i32 to index
    %c0_1 = arith.constant 0 : index
    %c0_2 = arith.constant 0 : index
    %3 = vector.load %arg1[%c0, %2, %c0_1, %c0_2] : memref<3x1x16x128xf32, #tpu.memory_space<vmem>>, vector<1x1x16x128xf32>
    %4 = vector.shape_cast %3 : vector<1x1x16x128xf32> to vector<16x128xf32>
    %c1 = arith.constant 1 : index
    %5 = arith.index_cast %1 : i32 to index
    %c0_3 = arith.constant 0 : index
    %c0_4 = arith.constant 0 : index
    %6 = vector.load %arg1[%c1, %5, %c0_3, %c0_4] : memref<3x1x16x128xf32, #tpu.memory_space<vmem>>, vector<1x1x16x128xf32>
    %7 = vector.shape_cast %6 : vector<1x1x16x128xf32> to vector<16x128xf32>
    %c2 = arith.constant 2 : index
    %8 = arith.index_cast %1 : i32 to index
    %c0_5 = arith.constant 0 : index
    %c0_6 = arith.constant 0 : index
    %9 = vector.load %arg1[%c2, %8, %c0_5, %c0_6] : memref<3x1x16x128xf32, #tpu.memory_space<vmem>>, vector<1x1x16x128xf32>
    %10 = vector.shape_cast %9 : vector<1x1x16x128xf32> to vector<16x128xf32>
    %11 = arith.mulf %4, %4 : vector<16x128xf32>
    %12 = arith.mulf %7, %7 : vector<16x128xf32>
    %13 = arith.addf %11, %12 : vector<16x128xf32>
    %14 = arith.mulf %10, %10 : vector<16x128xf32>
    %15 = arith.addf %13, %14 : vector<16x128xf32>
    %cst = arith.constant 1.000000e-24 : f32
    %16 = vector.broadcast %cst : f32 to vector<16x128xf32>
    %17 = arith.addf %15, %16 : vector<16x128xf32>
    %18 = math.rsqrt %17 : vector<16x128xf32>
    %19 = arith.mulf %10, %18 : vector<16x128xf32>
    %cst_7 = arith.constant -1.000000e+00 : f32
    %cst_8 = arith.constant 1.000000e+00 : f32
    %20 = vector.broadcast %cst_7 : f32 to vector<16x128xf32>
    %21 = arith.maximumf %20, %19 : vector<16x128xf32>
    %22 = vector.broadcast %cst_8 : f32 to vector<16x128xf32>
    %23 = arith.minimumf %22, %21 : vector<16x128xf32>
    %24 = arith.mulf %23, %23 : vector<16x128xf32>
    %cst_9 = arith.constant 1.000000e+00 : f32
    %25 = vector.broadcast %cst_9 : f32 to vector<16x128xf32>
    %26 = arith.subf %25, %24 : vector<16x128xf32>
    %cst_10 = arith.constant 9.99999982E-15 : f32
    %27 = vector.broadcast %cst_10 : f32 to vector<16x128xf32>
    %28 = arith.maximumf %26, %27 : vector<16x128xf32>
    %29 = math.sqrt %28 : vector<16x128xf32>
    %30 = arith.mulf %4, %4 : vector<16x128xf32>
    %31 = arith.mulf %7, %7 : vector<16x128xf32>
    %32 = arith.addf %30, %31 : vector<16x128xf32>
    %cst_11 = arith.constant 9.99999968E-21 : f32
    %33 = vector.broadcast %cst_11 : f32 to vector<16x128xf32>
    %34 = arith.addf %32, %33 : vector<16x128xf32>
    %35 = math.rsqrt %34 : vector<16x128xf32>
    %36 = arith.mulf %4, %35 : vector<16x128xf32>
    %37 = arith.mulf %7, %35 : vector<16x128xf32>
    %cst_12 = arith.constant 1.000000e+00 : f32
    %38 = vector.broadcast %cst_12 : f32 to vector<16x128xf32>
    %cst_13 = arith.constant 0.000000e+00 : f32
    %39 = vector.broadcast %cst_13 : f32 to vector<16x128xf32>
    %40 = arith.mulf %38, %36 : vector<16x128xf32>
    %41 = arith.mulf %39, %37 : vector<16x128xf32>
    %42 = arith.subf %40, %41 : vector<16x128xf32>
    %43 = arith.mulf %39, %36 : vector<16x128xf32>
    %44 = arith.mulf %38, %37 : vector<16x128xf32>
    %45 = arith.addf %43, %44 : vector<16x128xf32>
    %46 = arith.mulf %42, %36 : vector<16x128xf32>
    %47 = arith.mulf %45, %37 : vector<16x128xf32>
    %48 = arith.subf %46, %47 : vector<16x128xf32>
    %49 = arith.mulf %45, %36 : vector<16x128xf32>
    %50 = arith.mulf %42, %37 : vector<16x128xf32>
    %51 = arith.addf %49, %50 : vector<16x128xf32>
    %52 = arith.mulf %48, %36 : vector<16x128xf32>
    %53 = arith.mulf %51, %37 : vector<16x128xf32>
    %54 = arith.subf %52, %53 : vector<16x128xf32>
    %55 = arith.mulf %51, %36 : vector<16x128xf32>
    %56 = arith.mulf %48, %37 : vector<16x128xf32>
    %57 = arith.addf %55, %56 : vector<16x128xf32>
    %c0_14 = arith.constant 0 : index
    %58 = arith.index_cast %1 : i32 to index
    %c0_15 = arith.constant 0 : index
    %c0_16 = arith.constant 0 : index
    %59 = vector.load %arg2[%c0_14, %58, %c0_15, %c0_16] : memref<48x1x16x128xbf16, #tpu.memory_space<vmem>>, vector<1x1x16x128xbf16>
    %60 = vector.shape_cast %59 : vector<1x1x16x128xbf16> to vector<16x128xbf16>
    %61 = arith.extf %60 : vector<16x128xbf16> to vector<16x128xf32>
    %cst_17 = arith.constant 0.282094806 : f32
    %62 = vector.broadcast %cst_17 : f32 to vector<16x128xf32>
    %63 = arith.mulf %62, %61 : vector<16x128xf32>
    %c16 = arith.constant 16 : index
    %64 = arith.index_cast %1 : i32 to index
    %c0_18 = arith.constant 0 : index
    %c0_19 = arith.constant 0 : index
    %65 = vector.load %arg2[%c16, %64, %c0_18, %c0_19] : memref<48x1x16x128xbf16, #tpu.memory_space<vmem>>, vector<1x1x16x128xbf16>
    %66 = vector.shape_cast %65 : vector<1x1x16x128xbf16> to vector<16x128xbf16>
    %67 = arith.extf %66 : vector<16x128xbf16> to vector<16x128xf32>
    %cst_20 = arith.constant 0.282094806 : f32
    %68 = vector.broadcast %cst_20 : f32 to vector<16x128xf32>
    %69 = arith.mulf %68, %67 : vector<16x128xf32>
    %c32 = arith.constant 32 : index
    %70 = arith.index_cast %1 : i32 to index
    %c0_21 = arith.constant 0 : index
    %c0_22 = arith.constant 0 : index
    %71 = vector.load %arg2[%c32, %70, %c0_21, %c0_22] : memref<48x1x16x128xbf16, #tpu.memory_space<vmem>>, vector<1x1x16x128xbf16>
    %72 = vector.shape_cast %71 : vector<1x1x16x128xbf16> to vector<16x128xbf16>
    %73 = arith.extf %72 : vector<16x128xbf16> to vector<16x128xf32>
    %cst_23 = arith.constant 0.282094806 : f32
    %74 = vector.broadcast %cst_23 : f32 to vector<16x128xf32>
    %75 = arith.mulf %74, %73 : vector<16x128xf32>
    %cst_24 = arith.constant 1.000000e+00 : f32
    %76 = vector.broadcast %cst_24 : f32 to vector<16x128xf32>
    %cst_25 = arith.constant 1.000000e+00 : f32
    %77 = vector.broadcast %cst_25 : f32 to vector<16x128xf32>
    %78 = arith.mulf %77, %29 : vector<16x128xf32>
    %79 = arith.mulf %78, %76 : vector<16x128xf32>
    %cst_26 = arith.constant 1.000000e+00 : f32
    %80 = vector.broadcast %cst_26 : f32 to vector<16x128xf32>
    %81 = arith.mulf %80, %23 : vector<16x128xf32>
    %82 = arith.mulf %81, %76 : vector<16x128xf32>
    %cst_27 = arith.constant 1.000000e+00 : f32
    %83 = vector.broadcast %cst_27 : f32 to vector<16x128xf32>
    %84 = arith.mulf %82, %83 : vector<16x128xf32>
    %cst_28 = arith.constant 0.488602519 : f32
    %85 = vector.broadcast %cst_28 : f32 to vector<16x128xf32>
    %86 = arith.mulf %85, %84 : vector<16x128xf32>
    %c2_29 = arith.constant 2 : index
    %87 = arith.index_cast %1 : i32 to index
    %c0_30 = arith.constant 0 : index
    %c0_31 = arith.constant 0 : index
    %88 = vector.load %arg2[%c2_29, %87, %c0_30, %c0_31] : memref<48x1x16x128xbf16, #tpu.memory_space<vmem>>, vector<1x1x16x128xbf16>
    %89 = vector.shape_cast %88 : vector<1x1x16x128xbf16> to vector<16x128xbf16>
    %90 = arith.extf %89 : vector<16x128xbf16> to vector<16x128xf32>
    %91 = arith.mulf %86, %90 : vector<16x128xf32>
    %92 = arith.addf %63, %91 : vector<16x128xf32>
    %c18 = arith.constant 18 : index
    %93 = arith.index_cast %1 : i32 to index
    %c0_32 = arith.constant 0 : index
    %c0_33 = arith.constant 0 : index
    %94 = vector.load %arg2[%c18, %93, %c0_32, %c0_33] : memref<48x1x16x128xbf16, #tpu.memory_space<vmem>>, vector<1x1x16x128xbf16>
    %95 = vector.shape_cast %94 : vector<1x1x16x128xbf16> to vector<16x128xbf16>
    %96 = arith.extf %95 : vector<16x128xbf16> to vector<16x128xf32>
    %97 = arith.mulf %86, %96 : vector<16x128xf32>
    %98 = arith.addf %69, %97 : vector<16x128xf32>
    %c34 = arith.constant 34 : index
    %99 = arith.index_cast %1 : i32 to index
    %c0_34 = arith.constant 0 : index
    %c0_35 = arith.constant 0 : index
    %100 = vector.load %arg2[%c34, %99, %c0_34, %c0_35] : memref<48x1x16x128xbf16, #tpu.memory_space<vmem>>, vector<1x1x16x128xbf16>
    %101 = vector.shape_cast %100 : vector<1x1x16x128xbf16> to vector<16x128xbf16>
    %102 = arith.extf %101 : vector<16x128xbf16> to vector<16x128xf32>
    %103 = arith.mulf %86, %102 : vector<16x128xf32>
    %104 = arith.addf %75, %103 : vector<16x128xf32>
    %cst_36 = arith.constant -0.488602519 : f32
    %105 = vector.broadcast %cst_36 : f32 to vector<16x128xf32>
    %106 = arith.mulf %105, %79 : vector<16x128xf32>
    %107 = arith.mulf %106, %42 : vector<16x128xf32>
    %c3 = arith.constant 3 : index
    %108 = arith.index_cast %1 : i32 to index
    %c0_37 = arith.constant 0 : index
    %c0_38 = arith.constant 0 : index
    %109 = vector.load %arg2[%c3, %108, %c0_37, %c0_38] : memref<48x1x16x128xbf16, #tpu.memory_space<vmem>>, vector<1x1x16x128xbf16>
    %110 = vector.shape_cast %109 : vector<1x1x16x128xbf16> to vector<16x128xbf16>
    %111 = arith.extf %110 : vector<16x128xbf16> to vector<16x128xf32>
    %112 = arith.mulf %107, %111 : vector<16x128xf32>
    %113 = arith.addf %92, %112 : vector<16x128xf32>
    %c19 = arith.constant 19 : index
    %114 = arith.index_cast %1 : i32 to index
    %c0_39 = arith.constant 0 : index
    %c0_40 = arith.constant 0 : index
    %115 = vector.load %arg2[%c19, %114, %c0_39, %c0_40] : memref<48x1x16x128xbf16, #tpu.memory_space<vmem>>, vector<1x1x16x128xbf16>
    %116 = vector.shape_cast %115 : vector<1x1x16x128xbf16> to vector<16x128xbf16>
    %117 = arith.extf %116 : vector<16x128xbf16> to vector<16x128xf32>
    %118 = arith.mulf %107, %117 : vector<16x128xf32>
    %119 = arith.addf %98, %118 : vector<16x128xf32>
    %c35 = arith.constant 35 : index
    %120 = arith.index_cast %1 : i32 to index
    %c0_41 = arith.constant 0 : index
    %c0_42 = arith.constant 0 : index
    %121 = vector.load %arg2[%c35, %120, %c0_41, %c0_42] : memref<48x1x16x128xbf16, #tpu.memory_space<vmem>>, vector<1x1x16x128xbf16>
    %122 = vector.shape_cast %121 : vector<1x1x16x128xbf16> to vector<16x128xbf16>
    %123 = arith.extf %122 : vector<16x128xbf16> to vector<16x128xf32>
    %124 = arith.mulf %107, %123 : vector<16x128xf32>
    %125 = arith.addf %104, %124 : vector<16x128xf32>
    %cst_43 = arith.constant -0.488602519 : f32
    %126 = vector.broadcast %cst_43 : f32 to vector<16x128xf32>
    %127 = arith.mulf %126, %79 : vector<16x128xf32>
    %128 = arith.mulf %127, %45 : vector<16x128xf32>
    %c1_44 = arith.constant 1 : index
    %129 = arith.index_cast %1 : i32 to index
    %c0_45 = arith.constant 0 : index
    %c0_46 = arith.constant 0 : index
    %130 = vector.load %arg2[%c1_44, %129, %c0_45, %c0_46] : memref<48x1x16x128xbf16, #tpu.memory_space<vmem>>, vector<1x1x16x128xbf16>
    %131 = vector.shape_cast %130 : vector<1x1x16x128xbf16> to vector<16x128xbf16>
    %132 = arith.extf %131 : vector<16x128xbf16> to vector<16x128xf32>
    %133 = arith.mulf %128, %132 : vector<16x128xf32>
    %134 = arith.addf %113, %133 : vector<16x128xf32>
    %c17 = arith.constant 17 : index
    %135 = arith.index_cast %1 : i32 to index
    %c0_47 = arith.constant 0 : index
    %c0_48 = arith.constant 0 : index
    %136 = vector.load %arg2[%c17, %135, %c0_47, %c0_48] : memref<48x1x16x128xbf16, #tpu.memory_space<vmem>>, vector<1x1x16x128xbf16>
    %137 = vector.shape_cast %136 : vector<1x1x16x128xbf16> to vector<16x128xbf16>
    %138 = arith.extf %137 : vector<16x128xbf16> to vector<16x128xf32>
    %139 = arith.mulf %128, %138 : vector<16x128xf32>
    %140 = arith.addf %119, %139 : vector<16x128xf32>
    %c33 = arith.constant 33 : index
    %141 = arith.index_cast %1 : i32 to index
    %c0_49 = arith.constant 0 : index
    %c0_50 = arith.constant 0 : index
    %142 = vector.load %arg2[%c33, %141, %c0_49, %c0_50] : memref<48x1x16x128xbf16, #tpu.memory_space<vmem>>, vector<1x1x16x128xbf16>
    %143 = vector.shape_cast %142 : vector<1x1x16x128xbf16> to vector<16x128xbf16>
    %144 = arith.extf %143 : vector<16x128xbf16> to vector<16x128xf32>
    %145 = arith.mulf %128, %144 : vector<16x128xf32>
    %146 = arith.addf %125, %145 : vector<16x128xf32>
    %cst_51 = arith.constant 3.000000e+00 : f32
    %147 = vector.broadcast %cst_51 : f32 to vector<16x128xf32>
    %148 = arith.mulf %147, %29 : vector<16x128xf32>
    %149 = arith.mulf %148, %79 : vector<16x128xf32>
    %cst_52 = arith.constant 3.000000e+00 : f32
    %150 = vector.broadcast %cst_52 : f32 to vector<16x128xf32>
    %151 = arith.mulf %150, %23 : vector<16x128xf32>
    %152 = arith.mulf %151, %79 : vector<16x128xf32>
    %cst_53 = arith.constant 1.000000e+00 : f32
    %153 = vector.broadcast %cst_53 : f32 to vector<16x128xf32>
    %154 = arith.mulf %152, %153 : vector<16x128xf32>
    %cst_54 = arith.constant 3.000000e+00 : f32
    %155 = vector.broadcast %cst_54 : f32 to vector<16x128xf32>
    %156 = arith.mulf %155, %23 : vector<16x128xf32>
    %157 = arith.mulf %156, %84 : vector<16x128xf32>
    %cst_55 = arith.constant 1.000000e+00 : f32
    %158 = vector.broadcast %cst_55 : f32 to vector<16x128xf32>
    %159 = arith.mulf %158, %76 : vector<16x128xf32>
    %160 = arith.subf %157, %159 : vector<16x128xf32>
    %cst_56 = arith.constant 5.000000e-01 : f32
    %161 = vector.broadcast %cst_56 : f32 to vector<16x128xf32>
    %162 = arith.mulf %160, %161 : vector<16x128xf32>
    %cst_57 = arith.constant 0.63078314 : f32
    %163 = vector.broadcast %cst_57 : f32 to vector<16x128xf32>
    %164 = arith.mulf %163, %162 : vector<16x128xf32>
    %c6 = arith.constant 6 : index
    %165 = arith.index_cast %1 : i32 to index
    %c0_58 = arith.constant 0 : index
    %c0_59 = arith.constant 0 : index
    %166 = vector.load %arg2[%c6, %165, %c0_58, %c0_59] : memref<48x1x16x128xbf16, #tpu.memory_space<vmem>>, vector<1x1x16x128xbf16>
    %167 = vector.shape_cast %166 : vector<1x1x16x128xbf16> to vector<16x128xbf16>
    %168 = arith.extf %167 : vector<16x128xbf16> to vector<16x128xf32>
    %169 = arith.mulf %164, %168 : vector<16x128xf32>
    %170 = arith.addf %134, %169 : vector<16x128xf32>
    %c22 = arith.constant 22 : index
    %171 = arith.index_cast %1 : i32 to index
    %c0_60 = arith.constant 0 : index
    %c0_61 = arith.constant 0 : index
    %172 = vector.load %arg2[%c22, %171, %c0_60, %c0_61] : memref<48x1x16x128xbf16, #tpu.memory_space<vmem>>, vector<1x1x16x128xbf16>
    %173 = vector.shape_cast %172 : vector<1x1x16x128xbf16> to vector<16x128xbf16>
    %174 = arith.extf %173 : vector<16x128xbf16> to vector<16x128xf32>
    %175 = arith.mulf %164, %174 : vector<16x128xf32>
    %176 = arith.addf %140, %175 : vector<16x128xf32>
    %c38 = arith.constant 38 : index
    %177 = arith.index_cast %1 : i32 to index
    %c0_62 = arith.constant 0 : index
    %c0_63 = arith.constant 0 : index
    %178 = vector.load %arg2[%c38, %177, %c0_62, %c0_63] : memref<48x1x16x128xbf16, #tpu.memory_space<vmem>>, vector<1x1x16x128xbf16>
    %179 = vector.shape_cast %178 : vector<1x1x16x128xbf16> to vector<16x128xbf16>
    %180 = arith.extf %179 : vector<16x128xbf16> to vector<16x128xf32>
    %181 = arith.mulf %164, %180 : vector<16x128xf32>
    %182 = arith.addf %146, %181 : vector<16x128xf32>
    %cst_64 = arith.constant -0.3641828 : f32
    %183 = vector.broadcast %cst_64 : f32 to vector<16x128xf32>
    %184 = arith.mulf %183, %154 : vector<16x128xf32>
    %185 = arith.mulf %184, %42 : vector<16x128xf32>
    %c7 = arith.constant 7 : index
    %186 = arith.index_cast %1 : i32 to index
    %c0_65 = arith.constant 0 : index
    %c0_66 = arith.constant 0 : index
    %187 = vector.load %arg2[%c7, %186, %c0_65, %c0_66] : memref<48x1x16x128xbf16, #tpu.memory_space<vmem>>, vector<1x1x16x128xbf16>
    %188 = vector.shape_cast %187 : vector<1x1x16x128xbf16> to vector<16x128xbf16>
    %189 = arith.extf %188 : vector<16x128xbf16> to vector<16x128xf32>
    %190 = arith.mulf %185, %189 : vector<16x128xf32>
    %191 = arith.addf %170, %190 : vector<16x128xf32>
    %c23 = arith.constant 23 : index
    %192 = arith.index_cast %1 : i32 to index
    %c0_67 = arith.constant 0 : index
    %c0_68 = arith.constant 0 : index
    %193 = vector.load %arg2[%c23, %192, %c0_67, %c0_68] : memref<48x1x16x128xbf16, #tpu.memory_space<vmem>>, vector<1x1x16x128xbf16>
    %194 = vector.shape_cast %193 : vector<1x1x16x128xbf16> to vector<16x128xbf16>
    %195 = arith.extf %194 : vector<16x128xbf16> to vector<16x128xf32>
    %196 = arith.mulf %185, %195 : vector<16x128xf32>
    %197 = arith.addf %176, %196 : vector<16x128xf32>
    %c39 = arith.constant 39 : index
    %198 = arith.index_cast %1 : i32 to index
    %c0_69 = arith.constant 0 : index
    %c0_70 = arith.constant 0 : index
    %199 = vector.load %arg2[%c39, %198, %c0_69, %c0_70] : memref<48x1x16x128xbf16, #tpu.memory_space<vmem>>, vector<1x1x16x128xbf16>
    %200 = vector.shape_cast %199 : vector<1x1x16x128xbf16> to vector<16x128xbf16>
    %201 = arith.extf %200 : vector<16x128xbf16> to vector<16x128xf32>
    %202 = arith.mulf %185, %201 : vector<16x128xf32>
    %203 = arith.addf %182, %202 : vector<16x128xf32>
    %cst_71 = arith.constant -0.3641828 : f32
    %204 = vector.broadcast %cst_71 : f32 to vector<16x128xf32>
    %205 = arith.mulf %204, %154 : vector<16x128xf32>
    %206 = arith.mulf %205, %45 : vector<16x128xf32>
    %c5 = arith.constant 5 : index
    %207 = arith.index_cast %1 : i32 to index
    %c0_72 = arith.constant 0 : index
    %c0_73 = arith.constant 0 : index
    %208 = vector.load %arg2[%c5, %207, %c0_72, %c0_73] : memref<48x1x16x128xbf16, #tpu.memory_space<vmem>>, vector<1x1x16x128xbf16>
    %209 = vector.shape_cast %208 : vector<1x1x16x128xbf16> to vector<16x128xbf16>
    %210 = arith.extf %209 : vector<16x128xbf16> to vector<16x128xf32>
    %211 = arith.mulf %206, %210 : vector<16x128xf32>
    %212 = arith.addf %191, %211 : vector<16x128xf32>
    %c21 = arith.constant 21 : index
    %213 = arith.index_cast %1 : i32 to index
    %c0_74 = arith.constant 0 : index
    %c0_75 = arith.constant 0 : index
    %214 = vector.load %arg2[%c21, %213, %c0_74, %c0_75] : memref<48x1x16x128xbf16, #tpu.memory_space<vmem>>, vector<1x1x16x128xbf16>
    %215 = vector.shape_cast %214 : vector<1x1x16x128xbf16> to vector<16x128xbf16>
    %216 = arith.extf %215 : vector<16x128xbf16> to vector<16x128xf32>
    %217 = arith.mulf %206, %216 : vector<16x128xf32>
    %218 = arith.addf %197, %217 : vector<16x128xf32>
    %c37 = arith.constant 37 : index
    %219 = arith.index_cast %1 : i32 to index
    %c0_76 = arith.constant 0 : index
    %c0_77 = arith.constant 0 : index
    %220 = vector.load %arg2[%c37, %219, %c0_76, %c0_77] : memref<48x1x16x128xbf16, #tpu.memory_space<vmem>>, vector<1x1x16x128xbf16>
    %221 = vector.shape_cast %220 : vector<1x1x16x128xbf16> to vector<16x128xbf16>
    %222 = arith.extf %221 : vector<16x128xbf16> to vector<16x128xf32>
    %223 = arith.mulf %206, %222 : vector<16x128xf32>
    %224 = arith.addf %203, %223 : vector<16x128xf32>
    %cst_78 = arith.constant 0.1820914 : f32
    %225 = vector.broadcast %cst_78 : f32 to vector<16x128xf32>
    %226 = arith.mulf %225, %149 : vector<16x128xf32>
    %227 = arith.mulf %226, %48 : vector<16x128xf32>
    %c8 = arith.constant 8 : index
    %228 = arith.index_cast %1 : i32 to index
    %c0_79 = arith.constant 0 : index
    %c0_80 = arith.constant 0 : index
    %229 = vector.load %arg2[%c8, %228, %c0_79, %c0_80] : memref<48x1x16x128xbf16, #tpu.memory_space<vmem>>, vector<1x1x16x128xbf16>
    %230 = vector.shape_cast %229 : vector<1x1x16x128xbf16> to vector<16x128xbf16>
    %231 = arith.extf %230 : vector<16x128xbf16> to vector<16x128xf32>
    %232 = arith.mulf %227, %231 : vector<16x128xf32>
    %233 = arith.addf %212, %232 : vector<16x128xf32>
    %c24 = arith.constant 24 : index
    %234 = arith.index_cast %1 : i32 to index
    %c0_81 = arith.constant 0 : index
    %c0_82 = arith.constant 0 : index
    %235 = vector.load %arg2[%c24, %234, %c0_81, %c0_82] : memref<48x1x16x128xbf16, #tpu.memory_space<vmem>>, vector<1x1x16x128xbf16>
    %236 = vector.shape_cast %235 : vector<1x1x16x128xbf16> to vector<16x128xbf16>
    %237 = arith.extf %236 : vector<16x128xbf16> to vector<16x128xf32>
    %238 = arith.mulf %227, %237 : vector<16x128xf32>
    %239 = arith.addf %218, %238 : vector<16x128xf32>
    %c40 = arith.constant 40 : index
    %240 = arith.index_cast %1 : i32 to index
    %c0_83 = arith.constant 0 : index
    %c0_84 = arith.constant 0 : index
    %241 = vector.load %arg2[%c40, %240, %c0_83, %c0_84] : memref<48x1x16x128xbf16, #tpu.memory_space<vmem>>, vector<1x1x16x128xbf16>
    %242 = vector.shape_cast %241 : vector<1x1x16x128xbf16> to vector<16x128xbf16>
    %243 = arith.extf %242 : vector<16x128xbf16> to vector<16x128xf32>
    %244 = arith.mulf %227, %243 : vector<16x128xf32>
    %245 = arith.addf %224, %244 : vector<16x128xf32>
    %cst_85 = arith.constant 0.1820914 : f32
    %246 = vector.broadcast %cst_85 : f32 to vector<16x128xf32>
    %247 = arith.mulf %246, %149 : vector<16x128xf32>
    %248 = arith.mulf %247, %51 : vector<16x128xf32>
    %c4 = arith.constant 4 : index
    %249 = arith.index_cast %1 : i32 to index
    %c0_86 = arith.constant 0 : index
    %c0_87 = arith.constant 0 : index
    %250 = vector.load %arg2[%c4, %249, %c0_86, %c0_87] : memref<48x1x16x128xbf16, #tpu.memory_space<vmem>>, vector<1x1x16x128xbf16>
    %251 = vector.shape_cast %250 : vector<1x1x16x128xbf16> to vector<16x128xbf16>
    %252 = arith.extf %251 : vector<16x128xbf16> to vector<16x128xf32>
    %253 = arith.mulf %248, %252 : vector<16x128xf32>
    %254 = arith.addf %233, %253 : vector<16x128xf32>
    %c20 = arith.constant 20 : index
    %255 = arith.index_cast %1 : i32 to index
    %c0_88 = arith.constant 0 : index
    %c0_89 = arith.constant 0 : index
    %256 = vector.load %arg2[%c20, %255, %c0_88, %c0_89] : memref<48x1x16x128xbf16, #tpu.memory_space<vmem>>, vector<1x1x16x128xbf16>
    %257 = vector.shape_cast %256 : vector<1x1x16x128xbf16> to vector<16x128xbf16>
    %258 = arith.extf %257 : vector<16x128xbf16> to vector<16x128xf32>
    %259 = arith.mulf %248, %258 : vector<16x128xf32>
    %260 = arith.addf %239, %259 : vector<16x128xf32>
    %c36 = arith.constant 36 : index
    %261 = arith.index_cast %1 : i32 to index
    %c0_90 = arith.constant 0 : index
    %c0_91 = arith.constant 0 : index
    %262 = vector.load %arg2[%c36, %261, %c0_90, %c0_91] : memref<48x1x16x128xbf16, #tpu.memory_space<vmem>>, vector<1x1x16x128xbf16>
    %263 = vector.shape_cast %262 : vector<1x1x16x128xbf16> to vector<16x128xbf16>
    %264 = arith.extf %263 : vector<16x128xbf16> to vector<16x128xf32>
    %265 = arith.mulf %248, %264 : vector<16x128xf32>
    %266 = arith.addf %245, %265 : vector<16x128xf32>
    %cst_92 = arith.constant 5.000000e+00 : f32
    %267 = vector.broadcast %cst_92 : f32 to vector<16x128xf32>
    %268 = arith.mulf %267, %29 : vector<16x128xf32>
    %269 = arith.mulf %268, %149 : vector<16x128xf32>
    %cst_93 = arith.constant 5.000000e+00 : f32
    %270 = vector.broadcast %cst_93 : f32 to vector<16x128xf32>
    %271 = arith.mulf %270, %23 : vector<16x128xf32>
    %272 = arith.mulf %271, %149 : vector<16x128xf32>
    %cst_94 = arith.constant 1.000000e+00 : f32
    %273 = vector.broadcast %cst_94 : f32 to vector<16x128xf32>
    %274 = arith.mulf %272, %273 : vector<16x128xf32>
    %cst_95 = arith.constant 5.000000e+00 : f32
    %275 = vector.broadcast %cst_95 : f32 to vector<16x128xf32>
    %276 = arith.mulf %275, %23 : vector<16x128xf32>
    %277 = arith.mulf %276, %154 : vector<16x128xf32>
    %cst_96 = arith.constant 3.000000e+00 : f32
    %278 = vector.broadcast %cst_96 : f32 to vector<16x128xf32>
    %279 = arith.mulf %278, %79 : vector<16x128xf32>
    %280 = arith.subf %277, %279 : vector<16x128xf32>
    %cst_97 = arith.constant 5.000000e-01 : f32
    %281 = vector.broadcast %cst_97 : f32 to vector<16x128xf32>
    %282 = arith.mulf %280, %281 : vector<16x128xf32>
    %cst_98 = arith.constant 5.000000e+00 : f32
    %283 = vector.broadcast %cst_98 : f32 to vector<16x128xf32>
    %284 = arith.mulf %283, %23 : vector<16x128xf32>
    %285 = arith.mulf %284, %162 : vector<16x128xf32>
    %cst_99 = arith.constant 2.000000e+00 : f32
    %286 = vector.broadcast %cst_99 : f32 to vector<16x128xf32>
    %287 = arith.mulf %286, %84 : vector<16x128xf32>
    %288 = arith.subf %285, %287 : vector<16x128xf32>
    %cst_100 = arith.constant 0.333333343 : f32
    %289 = vector.broadcast %cst_100 : f32 to vector<16x128xf32>
    %290 = arith.mulf %288, %289 : vector<16x128xf32>
    %cst_101 = arith.constant 0.746352672 : f32
    %291 = vector.broadcast %cst_101 : f32 to vector<16x128xf32>
    %292 = arith.mulf %291, %290 : vector<16x128xf32>
    %c12 = arith.constant 12 : index
    %293 = arith.index_cast %1 : i32 to index
    %c0_102 = arith.constant 0 : index
    %c0_103 = arith.constant 0 : index
    %294 = vector.load %arg2[%c12, %293, %c0_102, %c0_103] : memref<48x1x16x128xbf16, #tpu.memory_space<vmem>>, vector<1x1x16x128xbf16>
    %295 = vector.shape_cast %294 : vector<1x1x16x128xbf16> to vector<16x128xbf16>
    %296 = arith.extf %295 : vector<16x128xbf16> to vector<16x128xf32>
    %297 = arith.mulf %292, %296 : vector<16x128xf32>
    %298 = arith.addf %254, %297 : vector<16x128xf32>
    %c28 = arith.constant 28 : index
    %299 = arith.index_cast %1 : i32 to index
    %c0_104 = arith.constant 0 : index
    %c0_105 = arith.constant 0 : index
    %300 = vector.load %arg2[%c28, %299, %c0_104, %c0_105] : memref<48x1x16x128xbf16, #tpu.memory_space<vmem>>, vector<1x1x16x128xbf16>
    %301 = vector.shape_cast %300 : vector<1x1x16x128xbf16> to vector<16x128xbf16>
    %302 = arith.extf %301 : vector<16x128xbf16> to vector<16x128xf32>
    %303 = arith.mulf %292, %302 : vector<16x128xf32>
    %304 = arith.addf %260, %303 : vector<16x128xf32>
    %c44 = arith.constant 44 : index
    %305 = arith.index_cast %1 : i32 to index
    %c0_106 = arith.constant 0 : index
    %c0_107 = arith.constant 0 : index
    %306 = vector.load %arg2[%c44, %305, %c0_106, %c0_107] : memref<48x1x16x128xbf16, #tpu.memory_space<vmem>>, vector<1x1x16x128xbf16>
    %307 = vector.shape_cast %306 : vector<1x1x16x128xbf16> to vector<16x128xbf16>
    %308 = arith.extf %307 : vector<16x128xbf16> to vector<16x128xf32>
    %309 = arith.mulf %292, %308 : vector<16x128xf32>
    %310 = arith.addf %266, %309 : vector<16x128xf32>
    %cst_108 = arith.constant -0.304697186 : f32
    %311 = vector.broadcast %cst_108 : f32 to vector<16x128xf32>
    %312 = arith.mulf %311, %282 : vector<16x128xf32>
    %313 = arith.mulf %312, %42 : vector<16x128xf32>
    %c13 = arith.constant 13 : index
    %314 = arith.index_cast %1 : i32 to index
    %c0_109 = arith.constant 0 : index
    %c0_110 = arith.constant 0 : index
    %315 = vector.load %arg2[%c13, %314, %c0_109, %c0_110] : memref<48x1x16x128xbf16, #tpu.memory_space<vmem>>, vector<1x1x16x128xbf16>
    %316 = vector.shape_cast %315 : vector<1x1x16x128xbf16> to vector<16x128xbf16>
    %317 = arith.extf %316 : vector<16x128xbf16> to vector<16x128xf32>
    %318 = arith.mulf %313, %317 : vector<16x128xf32>
    %319 = arith.addf %298, %318 : vector<16x128xf32>
    %c29 = arith.constant 29 : index
    %320 = arith.index_cast %1 : i32 to index
    %c0_111 = arith.constant 0 : index
    %c0_112 = arith.constant 0 : index
    %321 = vector.load %arg2[%c29, %320, %c0_111, %c0_112] : memref<48x1x16x128xbf16, #tpu.memory_space<vmem>>, vector<1x1x16x128xbf16>
    %322 = vector.shape_cast %321 : vector<1x1x16x128xbf16> to vector<16x128xbf16>
    %323 = arith.extf %322 : vector<16x128xbf16> to vector<16x128xf32>
    %324 = arith.mulf %313, %323 : vector<16x128xf32>
    %325 = arith.addf %304, %324 : vector<16x128xf32>
    %c45 = arith.constant 45 : index
    %326 = arith.index_cast %1 : i32 to index
    %c0_113 = arith.constant 0 : index
    %c0_114 = arith.constant 0 : index
    %327 = vector.load %arg2[%c45, %326, %c0_113, %c0_114] : memref<48x1x16x128xbf16, #tpu.memory_space<vmem>>, vector<1x1x16x128xbf16>
    %328 = vector.shape_cast %327 : vector<1x1x16x128xbf16> to vector<16x128xbf16>
    %329 = arith.extf %328 : vector<16x128xbf16> to vector<16x128xf32>
    %330 = arith.mulf %313, %329 : vector<16x128xf32>
    %331 = arith.addf %310, %330 : vector<16x128xf32>
    %cst_115 = arith.constant -0.304697186 : f32
    %332 = vector.broadcast %cst_115 : f32 to vector<16x128xf32>
    %333 = arith.mulf %332, %282 : vector<16x128xf32>
    %334 = arith.mulf %333, %45 : vector<16x128xf32>
    %c11 = arith.constant 11 : index
    %335 = arith.index_cast %1 : i32 to index
    %c0_116 = arith.constant 0 : index
    %c0_117 = arith.constant 0 : index
    %336 = vector.load %arg2[%c11, %335, %c0_116, %c0_117] : memref<48x1x16x128xbf16, #tpu.memory_space<vmem>>, vector<1x1x16x128xbf16>
    %337 = vector.shape_cast %336 : vector<1x1x16x128xbf16> to vector<16x128xbf16>
    %338 = arith.extf %337 : vector<16x128xbf16> to vector<16x128xf32>
    %339 = arith.mulf %334, %338 : vector<16x128xf32>
    %340 = arith.addf %319, %339 : vector<16x128xf32>
    %c27 = arith.constant 27 : index
    %341 = arith.index_cast %1 : i32 to index
    %c0_118 = arith.constant 0 : index
    %c0_119 = arith.constant 0 : index
    %342 = vector.load %arg2[%c27, %341, %c0_118, %c0_119] : memref<48x1x16x128xbf16, #tpu.memory_space<vmem>>, vector<1x1x16x128xbf16>
    %343 = vector.shape_cast %342 : vector<1x1x16x128xbf16> to vector<16x128xbf16>
    %344 = arith.extf %343 : vector<16x128xbf16> to vector<16x128xf32>
    %345 = arith.mulf %334, %344 : vector<16x128xf32>
    %346 = arith.addf %325, %345 : vector<16x128xf32>
    %c43 = arith.constant 43 : index
    %347 = arith.index_cast %1 : i32 to index
    %c0_120 = arith.constant 0 : index
    %c0_121 = arith.constant 0 : index
    %348 = vector.load %arg2[%c43, %347, %c0_120, %c0_121] : memref<48x1x16x128xbf16, #tpu.memory_space<vmem>>, vector<1x1x16x128xbf16>
    %349 = vector.shape_cast %348 : vector<1x1x16x128xbf16> to vector<16x128xbf16>
    %350 = arith.extf %349 : vector<16x128xbf16> to vector<16x128xf32>
    %351 = arith.mulf %334, %350 : vector<16x128xf32>
    %352 = arith.addf %331, %351 : vector<16x128xf32>
    %cst_122 = arith.constant 0.0963537171 : f32
    %353 = vector.broadcast %cst_122 : f32 to vector<16x128xf32>
    %354 = arith.mulf %353, %274 : vector<16x128xf32>
    %355 = arith.mulf %354, %48 : vector<16x128xf32>
    %c14 = arith.constant 14 : index
    %356 = arith.index_cast %1 : i32 to index
    %c0_123 = arith.constant 0 : index
    %c0_124 = arith.constant 0 : index
    %357 = vector.load %arg2[%c14, %356, %c0_123, %c0_124] : memref<48x1x16x128xbf16, #tpu.memory_space<vmem>>, vector<1x1x16x128xbf16>
    %358 = vector.shape_cast %357 : vector<1x1x16x128xbf16> to vector<16x128xbf16>
    %359 = arith.extf %358 : vector<16x128xbf16> to vector<16x128xf32>
    %360 = arith.mulf %355, %359 : vector<16x128xf32>
    %361 = arith.addf %340, %360 : vector<16x128xf32>
    %c30 = arith.constant 30 : index
    %362 = arith.index_cast %1 : i32 to index
    %c0_125 = arith.constant 0 : index
    %c0_126 = arith.constant 0 : index
    %363 = vector.load %arg2[%c30, %362, %c0_125, %c0_126] : memref<48x1x16x128xbf16, #tpu.memory_space<vmem>>, vector<1x1x16x128xbf16>
    %364 = vector.shape_cast %363 : vector<1x1x16x128xbf16> to vector<16x128xbf16>
    %365 = arith.extf %364 : vector<16x128xbf16> to vector<16x128xf32>
    %366 = arith.mulf %355, %365 : vector<16x128xf32>
    %367 = arith.addf %346, %366 : vector<16x128xf32>
    %c46 = arith.constant 46 : index
    %368 = arith.index_cast %1 : i32 to index
    %c0_127 = arith.constant 0 : index
    %c0_128 = arith.constant 0 : index
    %369 = vector.load %arg2[%c46, %368, %c0_127, %c0_128] : memref<48x1x16x128xbf16, #tpu.memory_space<vmem>>, vector<1x1x16x128xbf16>
    %370 = vector.shape_cast %369 : vector<1x1x16x128xbf16> to vector<16x128xbf16>
    %371 = arith.extf %370 : vector<16x128xbf16> to vector<16x128xf32>
    %372 = arith.mulf %355, %371 : vector<16x128xf32>
    %373 = arith.addf %352, %372 : vector<16x128xf32>
    %cst_129 = arith.constant 0.0963537171 : f32
    %374 = vector.broadcast %cst_129 : f32 to vector<16x128xf32>
    %375 = arith.mulf %374, %274 : vector<16x128xf32>
    %376 = arith.mulf %375, %51 : vector<16x128xf32>
    %c10 = arith.constant 10 : index
    %377 = arith.index_cast %1 : i32 to index
    %c0_130 = arith.constant 0 : index
    %c0_131 = arith.constant 0 : index
    %378 = vector.load %arg2[%c10, %377, %c0_130, %c0_131] : memref<48x1x16x128xbf16, #tpu.memory_space<vmem>>, vector<1x1x16x128xbf16>
    %379 = vector.shape_cast %378 : vector<1x1x16x128xbf16> to vector<16x128xbf16>
    %380 = arith.extf %379 : vector<16x128xbf16> to vector<16x128xf32>
    %381 = arith.mulf %376, %380 : vector<16x128xf32>
    %382 = arith.addf %361, %381 : vector<16x128xf32>
    %c26 = arith.constant 26 : index
    %383 = arith.index_cast %1 : i32 to index
    %c0_132 = arith.constant 0 : index
    %c0_133 = arith.constant 0 : index
    %384 = vector.load %arg2[%c26, %383, %c0_132, %c0_133] : memref<48x1x16x128xbf16, #tpu.memory_space<vmem>>, vector<1x1x16x128xbf16>
    %385 = vector.shape_cast %384 : vector<1x1x16x128xbf16> to vector<16x128xbf16>
    %386 = arith.extf %385 : vector<16x128xbf16> to vector<16x128xf32>
    %387 = arith.mulf %376, %386 : vector<16x128xf32>
    %388 = arith.addf %367, %387 : vector<16x128xf32>
    %c42 = arith.constant 42 : index
    %389 = arith.index_cast %1 : i32 to index
    %c0_134 = arith.constant 0 : index
    %c0_135 = arith.constant 0 : index
    %390 = vector.load %arg2[%c42, %389, %c0_134, %c0_135] : memref<48x1x16x128xbf16, #tpu.memory_space<vmem>>, vector<1x1x16x128xbf16>
    %391 = vector.shape_cast %390 : vector<1x1x16x128xbf16> to vector<16x128xbf16>
    %392 = arith.extf %391 : vector<16x128xbf16> to vector<16x128xf32>
    %393 = arith.mulf %376, %392 : vector<16x128xf32>
    %394 = arith.addf %373, %393 : vector<16x128xf32>
    %cst_136 = arith.constant -0.0393362381 : f32
    %395 = vector.broadcast %cst_136 : f32 to vector<16x128xf32>
    %396 = arith.mulf %395, %269 : vector<16x128xf32>
    %397 = arith.mulf %396, %54 : vector<16x128xf32>
    %c15 = arith.constant 15 : index
    %398 = arith.index_cast %1 : i32 to index
    %c0_137 = arith.constant 0 : index
    %c0_138 = arith.constant 0 : index
    %399 = vector.load %arg2[%c15, %398, %c0_137, %c0_138] : memref<48x1x16x128xbf16, #tpu.memory_space<vmem>>, vector<1x1x16x128xbf16>
    %400 = vector.shape_cast %399 : vector<1x1x16x128xbf16> to vector<16x128xbf16>
    %401 = arith.extf %400 : vector<16x128xbf16> to vector<16x128xf32>
    %402 = arith.mulf %397, %401 : vector<16x128xf32>
    %403 = arith.addf %382, %402 : vector<16x128xf32>
    %c31 = arith.constant 31 : index
    %404 = arith.index_cast %1 : i32 to index
    %c0_139 = arith.constant 0 : index
    %c0_140 = arith.constant 0 : index
    %405 = vector.load %arg2[%c31, %404, %c0_139, %c0_140] : memref<48x1x16x128xbf16, #tpu.memory_space<vmem>>, vector<1x1x16x128xbf16>
    %406 = vector.shape_cast %405 : vector<1x1x16x128xbf16> to vector<16x128xbf16>
    %407 = arith.extf %406 : vector<16x128xbf16> to vector<16x128xf32>
    %408 = arith.mulf %397, %407 : vector<16x128xf32>
    %409 = arith.addf %388, %408 : vector<16x128xf32>
    %c47 = arith.constant 47 : index
    %410 = arith.index_cast %1 : i32 to index
    %c0_141 = arith.constant 0 : index
    %c0_142 = arith.constant 0 : index
    %411 = vector.load %arg2[%c47, %410, %c0_141, %c0_142] : memref<48x1x16x128xbf16, #tpu.memory_space<vmem>>, vector<1x1x16x128xbf16>
    %412 = vector.shape_cast %411 : vector<1x1x16x128xbf16> to vector<16x128xbf16>
    %413 = arith.extf %412 : vector<16x128xbf16> to vector<16x128xf32>
    %414 = arith.mulf %397, %413 : vector<16x128xf32>
    %415 = arith.addf %394, %414 : vector<16x128xf32>
    %cst_143 = arith.constant -0.0393362381 : f32
    %416 = vector.broadcast %cst_143 : f32 to vector<16x128xf32>
    %417 = arith.mulf %416, %269 : vector<16x128xf32>
    %418 = arith.mulf %417, %57 : vector<16x128xf32>
    %c9 = arith.constant 9 : index
    %419 = arith.index_cast %1 : i32 to index
    %c0_144 = arith.constant 0 : index
    %c0_145 = arith.constant 0 : index
    %420 = vector.load %arg2[%c9, %419, %c0_144, %c0_145] : memref<48x1x16x128xbf16, #tpu.memory_space<vmem>>, vector<1x1x16x128xbf16>
    %421 = vector.shape_cast %420 : vector<1x1x16x128xbf16> to vector<16x128xbf16>
    %422 = arith.extf %421 : vector<16x128xbf16> to vector<16x128xf32>
    %423 = arith.mulf %418, %422 : vector<16x128xf32>
    %424 = arith.addf %403, %423 : vector<16x128xf32>
    %c25 = arith.constant 25 : index
    %425 = arith.index_cast %1 : i32 to index
    %c0_146 = arith.constant 0 : index
    %c0_147 = arith.constant 0 : index
    %426 = vector.load %arg2[%c25, %425, %c0_146, %c0_147] : memref<48x1x16x128xbf16, #tpu.memory_space<vmem>>, vector<1x1x16x128xbf16>
    %427 = vector.shape_cast %426 : vector<1x1x16x128xbf16> to vector<16x128xbf16>
    %428 = arith.extf %427 : vector<16x128xbf16> to vector<16x128xf32>
    %429 = arith.mulf %418, %428 : vector<16x128xf32>
    %430 = arith.addf %409, %429 : vector<16x128xf32>
    %c41 = arith.constant 41 : index
    %431 = arith.index_cast %1 : i32 to index
    %c0_148 = arith.constant 0 : index
    %c0_149 = arith.constant 0 : index
    %432 = vector.load %arg2[%c41, %431, %c0_148, %c0_149] : memref<48x1x16x128xbf16, #tpu.memory_space<vmem>>, vector<1x1x16x128xbf16>
    %433 = vector.shape_cast %432 : vector<1x1x16x128xbf16> to vector<16x128xbf16>
    %434 = arith.extf %433 : vector<16x128xbf16> to vector<16x128xf32>
    %435 = arith.mulf %418, %434 : vector<16x128xf32>
    %436 = arith.addf %415, %435 : vector<16x128xf32>
    %cst_150 = arith.constant 0.000000e+00 : f32
    %cst_151 = arith.constant 1.000000e+00 : f32
    %437 = vector.broadcast %cst_150 : f32 to vector<16x128xf32>
    %438 = arith.maximumf %437, %424 : vector<16x128xf32>
    %439 = vector.broadcast %cst_151 : f32 to vector<16x128xf32>
    %440 = arith.minimumf %439, %438 : vector<16x128xf32>
    %c0_152 = arith.constant 0 : index
    %441 = arith.index_cast %1 : i32 to index
    %c0_153 = arith.constant 0 : index
    %c0_154 = arith.constant 0 : index
    %442 = vector.load %arg3[%c0_152, %441, %c0_153, %c0_154] : memref<3x1x16x128xf32, #tpu.memory_space<vmem>>, vector<1x1x16x128xf32>
    %443 = vector.shape_cast %442 : vector<1x1x16x128xf32> to vector<16x128xf32>
    %444 = vector.shape_cast %440 : vector<16x128xf32> to vector<1x1x16x128xf32>
    tpu.vector_store %arg3[%c0_152, %441, %c0_153, %c0_154], %444 {strides = array<i32>} : memref<3x1x16x128xf32, #tpu.memory_space<vmem>>, vector<1x1x16x128xf32>,
    %cst_155 = arith.constant 0.000000e+00 : f32
    %cst_156 = arith.constant 1.000000e+00 : f32
    %445 = vector.broadcast %cst_155 : f32 to vector<16x128xf32>
    %446 = arith.maximumf %445, %430 : vector<16x128xf32>
    %447 = vector.broadcast %cst_156 : f32 to vector<16x128xf32>
    %448 = arith.minimumf %447, %446 : vector<16x128xf32>
    %c1_157 = arith.constant 1 : index
    %449 = arith.index_cast %1 : i32 to index
    %c0_158 = arith.constant 0 : index
    %c0_159 = arith.constant 0 : index
    %450 = vector.load %arg3[%c1_157, %449, %c0_158, %c0_159] : memref<3x1x16x128xf32, #tpu.memory_space<vmem>>, vector<1x1x16x128xf32>
    %451 = vector.shape_cast %450 : vector<1x1x16x128xf32> to vector<16x128xf32>
    %452 = vector.shape_cast %448 : vector<16x128xf32> to vector<1x1x16x128xf32>
    tpu.vector_store %arg3[%c1_157, %449, %c0_158, %c0_159], %452 {strides = array<i32>} : memref<3x1x16x128xf32, #tpu.memory_space<vmem>>, vector<1x1x16x128xf32>,
    %cst_160 = arith.constant 0.000000e+00 : f32
    %cst_161 = arith.constant 1.000000e+00 : f32
    %453 = vector.broadcast %cst_160 : f32 to vector<16x128xf32>
    %454 = arith.maximumf %453, %436 : vector<16x128xf32>
    %455 = vector.broadcast %cst_161 : f32 to vector<16x128xf32>
    %456 = arith.minimumf %455, %454 : vector<16x128xf32>
    %c2_162 = arith.constant 2 : index
    %457 = arith.index_cast %1 : i32 to index
    %c0_163 = arith.constant 0 : index
    %c0_164 = arith.constant 0 : index
    %458 = vector.load %arg3[%c2_162, %457, %c0_163, %c0_164] : memref<3x1x16x128xf32, #tpu.memory_space<vmem>>, vector<1x1x16x128xf32>
    %459 = vector.shape_cast %458 : vector<1x1x16x128xf32> to vector<16x128xf32>
    %460 = vector.shape_cast %456 : vector<16x128xf32> to vector<1x1x16x128xf32>
    tpu.vector_store %arg3[%c2_162, %457, %c0_163, %c0_164], %460 {strides = array<i32>} : memref<3x1x16x128xf32, #tpu.memory_space<vmem>>, vector<1x1x16x128xf32>,
    %c1_i32_165 = arith.constant 1 : i32
    return
  }
  func.func @transform_0(%arg0: i32) -> (i32, i32, i32, i32) {
    %c0_i32 = arith.constant 0 : i32
    %c0_i32_0 = arith.constant 0 : i32
    %c0_i32_1 = arith.constant 0 : i32
    %c0_i32_2 = arith.constant 0 : i32
    return %c0_i32, %arg0, %c0_i32_0, %c0_i32_1 : i32, i32, i32, i32
  }
  func.func @transform_1(%arg0: i32) -> (i32, i32, i32, i32) {
    %c0_i32 = arith.constant 0 : i32
    %c0_i32_0 = arith.constant 0 : i32
    %c0_i32_1 = arith.constant 0 : i32
    %c0_i32_2 = arith.constant 0 : i32
    return %c0_i32, %arg0, %c0_i32_0, %c0_i32_1 : i32, i32, i32, i32
  }
  func.func @transform_2(%arg0: i32) -> (i32, i32, i32, i32) {
    %c0_i32 = arith.constant 0 : i32
    %c0_i32_0 = arith.constant 0 : i32
    %c0_i32_1 = arith.constant 0 : i32
    %c0_i32_2 = arith.constant 0 : i32
    return %c0_i32, %arg0, %c0_i32_0, %c0_i32_1 : i32, i32, i32, i32
  }
}

</mosaic_0001>

<bundles_post_ra>
// kernel: forward.1
= control target key start
LH: loop header
LB: loop body
LE: loop exit
PB: predicated region body
PF: predicated region fallthrough
CT: control target
= control target key end

     0   :  { %s1675_s0 = inlined_call_operand.vmem [shape: f32[3,1,16,128], index: 0, kind: input, shape index: {}]   ;;  %s1676_s1 = inlined_call_operand.vmem [shape: bf16[48,1,16,128], index: 1, kind: input, shape index: {}]   ;;  %s1677_s2 = inlined_call_operand.vmem [shape: f32[3,1,16,128], index: 2, kind: output, shape index: {}]  }
   0x1   :  { %v1001_v0 = vld [vmem:[%s1675_s0] sm:$0xff]  ;;  %v1006_v1 = vld [vmem:[%s1675_s0 + $0x8] sm:$0xff]  ;;  %v1011_v2 = vld [vmem:[%s1675_s0 + $0x10] sm:$0xff] }
   0x2   :  { %v1016_v3 = vld [vmem:[%s1675_s0 + $0x18] sm:$0xff]  ;;  %v1021_v4 = vld [vmem:[%s1675_s0 + $0x20] sm:$0xff]  ;;  %v1026_v5 = vld [vmem:[%s1675_s0 + $0x28] sm:$0xff]  ;;  %v19_v6 = vmul.f32 %v1001_v0, %v1001_v0  ;;  %v20_v7 = vmul.f32 %v1006_v1, %v1006_v1  ;;  %v21_v8 = vmul.f32 %v1011_v2, %v1011_v2 }
   0x3   :  { %v22_v9 = vmul.f32 %v1016_v3, %v1016_v3  ;;  %v25_v10 = vmul.f32 %v1021_v4, %v1021_v4  ;;  %v26_v11 = vmul.f32 %v1026_v5, %v1026_v5  ;;  %v733_v12 = vld [vmem:[%s1676_s1] sm:$0xff]   ;;  %v1052_v25 = vld [vmem:[%s1676_s1 + $0x10] sm:$0xff]   ;;  %v1067_v30 = vld [vmem:[%s1676_s1 + $0x18] sm:$0xff]  }
   0x4   :  { %v924_v13 = vld [vmem:[%s1676_s1 + $0x80] sm:$0xff]   ;;  %v23_v15 = vadd.f32 %v21_v8, %v19_v6  ;;  %v734_v16 = vunpack.c.l.bf16 %v733_v12  ;;  %v735_v18 = vunpack.c.h.bf16 %v733_v12  ;;  %v1057_v28 = vld [vmem:[%s1676_s1 + $0x90] sm:$0xff]   ;;  %v1074_v33 = vld [vmem:[%s1676_s1 + $0x98] sm:$0xff]   ;;  %v746_v41 = vunpack.c.l.bf16 %v1052_v25 }
   0x5   :  { %v925_v14 = vld [vmem:[%s1676_s1 + $0x100] sm:$0xff]   ;;  %v24_v17 = vadd.f32 %v22_v9, %v20_v7  ;;  %v738_v19 = vunpack.c.l.bf16 %v924_v13  ;;  %v739_v20 = vunpack.c.h.bf16 %v924_v13  ;;  %v1062_v29 = vld [vmem:[%s1676_s1 + $0x110] sm:$0xff]   ;;  %v1079_v34 = vld [vmem:[%s1676_s1 + $0x118] sm:$0xff]   ;;  %v747_v42 = vunpack.c.h.bf16 %v1052_v25 }
   0x6   :  { %v27_v21 = vadd.f32 %v25_v10, %v23_v15  ;;  %v59_v22 = vadd.f32 1e-20, %v23_v15  ;;  %v742_v23 = vunpack.c.l.bf16 %v925_v14  ;;  %v743_v24 = vunpack.c.h.bf16 %v925_v14  ;;  %v1097_v44 = vld [vmem:[%s1676_s1 + $0x8] sm:$0xff]   ;;  %v1116_v51 = vld [vmem:[%s1676_s1 + $0x30] sm:$0xff]   ;;  %v1139_v62 = vld [vmem:[%s1676_s1 + $0x38] sm:$0xff]  }
   0x7   :  { %v28_v26 = vadd.f32 %v26_v11, %v24_v17  ;;  %v60_v27 = vadd.f32 1e-20, %v24_v17  ;;  %v1069_v32 = vmul.f32 0.2820948, %v734_v16  ;;  %v1081_v36 = vmul.f32 0.2820948, %v735_v18 }
   0x8   :  { %v29_v31 = vadd.f32 1e-24, %v27_v21  ;;  %971 = vrsqrt.f32 %v59_v22  ;;  %v1083_v37 = vmul.f32 0.2820948, %v738_v19  ;;  %v1085_v38 = vmul.f32 0.2820948, %v739_v20 }
   0x9   :  { %v30_v35 = vadd.f32 1e-24, %v28_v26  ;;  %973 = vrsqrt.f32 %v60_v27  ;;  %v1087_v39 = vmul.f32 0.2820948, %v742_v23  ;;  %v1089_v40 = vmul.f32 0.2820948, %v743_v24 }
   0xa   :  { %975 = vrsqrt.f32 %v29_v31  ;;  %v750_v43 = vunpack.c.l.bf16 %v1057_v28  ;;  %v1102_v45 = vld [vmem:[%s1676_s1 + $0x88] sm:$0xff]   ;;  %v751_v46 = vunpack.c.h.bf16 %v1057_v28  ;;  %v754_v47 = vunpack.c.l.bf16 %v1062_v29  ;;  %v1125_v56 = vld [vmem:[%s1676_s1 + $0xb0] sm:$0xff]   ;;  %v1144_v63 = vld [vmem:[%s1676_s1 + $0xb8] sm:$0xff]  }
   0xb   :  { %977 = vrsqrt.f32 %v30_v35  ;;  %v1111_v50 = vld [vmem:[%s1676_s1 + $0x108] sm:$0xff]   ;;  %v1130_v57 = vld [vmem:[%s1676_s1 + $0x130] sm:$0xff]   ;;  %v1153_v10 = vld [vmem:[%s1676_s1 + $0x138] sm:$0xff]   ;;  %v1705_v55 = vunpack.c.h.bf16 %v1062_v29 }
   0xc   :  { %v1158_v11 = vld [vmem:[%s1676_s1 + $0x28] sm:$0xff]   ;;  %v1191_v23 = vld [vmem:[%s1676_s1 + $0x40] sm:$0xff]  }
   0xd   :  { %v1167_v16 = vld [vmem:[%s1676_s1 + $0xa8] sm:$0xff]   ;;  %v1203_v14 = vld [vmem:[%s1676_s1 + $0xc0] sm:$0xff]  }
   0xe   :  { %v1176_v21 = vld [vmem:[%s1676_s1 + $0x128] sm:$0xff]   ;;  %v1308_v25 = vld [vmem:[%s1676_s1 + $0xa0] sm:$0xff]  }
   0xf   :  { %v1313_v28 = vld [vmem:[%s1676_s1 + $0x120] sm:$0xff]  }
  0x10   :  { %1703 = vst [vmem:[#allocation7_spill] sm:$0xff] %v1313_v28 }
  0x12   :  { %v972_v22 = vpop.eup %971 }
  0x13   :  { %v974_v31 = vpop.eup %973  ;;  %v1183_v35 = vmul.f32 %v972_v22, %v1001_v0  ;;  %v65_v19 = vmul.f32 %v972_v22, %v1011_v2 }
  0x14   :  { %v976_v24 = vpop.eup %975  ;;  %v64_v26 = vmul.f32 %v974_v31, %v1006_v1  ;;  %v66_v27 = vmul.f32 %v974_v31, %v1016_v3 }
  0x15   :  { %v978_v15 = vpop.eup %977  ;;  %v33_v2 = vmul.f32 %v976_v24, %v1021_v4  ;;  %v67_v22 = vmul.f32 0.0, %v65_v19  ;;  %v71_v18 = vmul.f32 0.0, %v1183_v35 }
  0x16   :  { %v34_v1 = vmul.f32 %v978_v15, %v1026_v5  ;;  %v68_v3 = vmul.f32 0.0, %v66_v27  ;;  %v72_v31 = vmul.f32 0.0, %v64_v26 }
  0x17   :  { %v1207_v0 = vclamps-f32 %v33_v2, 1.0  ;;  %v1210_v4 = vsub.f32 %v1183_v35, %v67_v22  ;;  %v1212_v24 = vadd.f32 %v71_v18, %v65_v19 }
  0x18   :  { %v1215_v8 = vclamps-f32 %v34_v1, 1.0  ;;  %v1217_v7 = vsub.f32 %v64_v26, %v68_v3  ;;  %v1219_v6 = vadd.f32 %v72_v31, %v66_v27  ;;  %v1232_v1 = vld [vmem:[%s1676_s1 + $0x140] sm:$0xff]  }
  0x19   :  { %v39_v15 = vmul.f32 %v1207_v0, %v1207_v0  ;;  %v75_v2 = vmul.f32 %v1210_v4, %v1183_v35  ;;  %v77_v22 = vmul.f32 %v1212_v24, %v65_v19  ;;  %v81_v18 = vmul.f32 %v1212_v24, %v1183_v35  ;;  %v1237_v3 = vld [vmem:[%s1676_s1 + $0x20] sm:$0xff]  }
  0x1a   :  { %v40_v31 = vmul.f32 %v1215_v8, %v1215_v8  ;;  %v76_v5 = vmul.f32 %v1217_v7, %v64_v26  ;;  %v78_v20 = vmul.f32 %v1219_v6, %v66_v27  ;;  %v82_v17 = vmul.f32 %v1219_v6, %v64_v26 }
  0x1b   :  { %v41_v61 = vsub.f32 1.0, %v39_v15  ;;  %v83_v60 = vmul.f32 %v1210_v4, %v65_v19  ;;  %v84_v58 = vmul.f32 %v1217_v7, %v66_v27  ;;  %v1252_v13 = vsub.f32 %v75_v2, %v77_v22 }
  0x1c   :  { %v42_v52 = vsub.f32 1.0, %v40_v31  ;;  %v1254_v12 = vsub.f32 %v76_v5, %v78_v20  ;;  %v119_v15 = vmul.f32 0.48860252, %v1207_v0  ;;  %v120_v31 = vmul.f32 0.48860252, %v1215_v8 }
  0x1d   :  { %v1250_v49 = vmax.f32 %v41_v61, 1e-14  ;;  %v1259_v48 = vadd.f32 %v83_v60, %v81_v18  ;;  %v1261_v54 = vadd.f32 %v84_v58, %v82_v17  ;;  %v1267_v61 = vmul.f32 %v1252_v13, %v1183_v35 }
  0x1e   :  { %v1257_v9 = vmax.f32 %v42_v52, 1e-14  ;;  %v1270_v2 = vmul.f32 %v1254_v12, %v64_v26  ;;  %v95_v20 = vmul.f32 %v1252_v13, %v65_v19  ;;  %v96_v58 = vmul.f32 %v1254_v12, %v66_v27 }
  0x1f   :  { %979 = vrsqrt.f32 %v1250_v49  ;;  %1698 = vst [vmem:[#allocation2_spill] sm:$0xff] %v1267_v61  ;;  %vm47_vm0 = vcmp.eq.f32.partialorder %v1250_v49, inf  ;;  %v1279_v17 = vmul.f32 %v1259_v48, %v65_v19  ;;  %v1282_v5 = vmul.f32 %v1261_v54, %v66_v27 }
  0x20   :  { %1699 = vst [vmem:[#allocation3_spill] sm:$0xff] %v1270_v2  ;;  %981 = vrsqrt.f32 %v1257_v9  ;;  %v93_v22 = vmul.f32 %v1259_v48, %v1183_v35  ;;  %v94_v18 = vmul.f32 %v1261_v54, %v64_v26  ;;  %vm49_vm1 = vcmp.eq.f32.partialorder %v1250_v49, 0.0 }
  0x21   :  { %1700 = vst [vmem:[#allocation4_spill] sm:$0xff] %v1279_v17  ;;  %1701 = vst [vmem:[#allocation5_spill] sm:$0xff] %v1282_v5  ;;  %vm54_vm2 = vcmp.eq.f32.partialorder %v1257_v9, inf  ;;  %v126_v60 = vmul.f32 %v746_v41, %v119_v15  ;;  %v127_v53 = vmul.f32 %v747_v42, %v120_v31  ;;  %v135_v19 = vmul.f32 %v750_v43, %v119_v15 }
  0x22   :  { %v136_v27 = vmul.f32 %v751_v46, %v120_v31  ;;  %vm56_vm3 = vcmp.eq.f32.partialorder %v1257_v9, 0.0  ;;  %v57_v26 = vand.u32 2147483648, %v1257_v9  ;;  %v1303_v41 = vadd.f32 %v95_v20, %v93_v22 }
  0x23   :  { %v1315_v42 = vadd.f32 %v96_v58, %v94_v18  ;;  %v1318_v43 = vadd.f32 %v126_v60, %v1069_v32  ;;  %v1321_v46 = vadd.f32 %v127_v53, %v1081_v36  ;;  %v1324_v20 = vadd.f32 %v135_v19, %v1083_v37 }
  0x24   :  { %1702 = vst [vmem:[#allocation6_spill] sm:$0xff] %v1303_v41  ;;  %v144_v22 = vmul.f32 %v754_v47, %v119_v15  ;;  %v145_v35 = vmul.f32 %v1705_v55, %v120_v31  ;;  %v212_v59 = vmul.f32 3.0, %v1207_v0  ;;  %v213_v58 = vmul.f32 3.0, %v1215_v8  ;;  %v1341_v47 = vld [vmem:[%s1676_s1 + $0x60] sm:$0xff]  }
  0x25   :  { %1704 = vst [vmem:[#allocation8_spill] sm:$0xff] %v1315_v42  ;;  %v1333_v18 = vadd.f32 %v136_v27, %v1085_v38  ;;  %1706 = vst [vmem:[#allocation9_spill] sm:$0xff] %v1341_v47  ;;  %v1350_v15 = vld [vmem:[%s1676_s1 + $0xe0] sm:$0xff]   ;;  %v1354_v60 = vmul.f32 5.0, %v1207_v0  ;;  %v1357_v19 = vmul.f32 5.0, %v1215_v8  ;;  %v1368_v36 = vmul.f32 2.0, %v1215_v8 }
  0x26   :  { %v146_v29 = vadd.f32 %v144_v22, %v1087_v39  ;;  %v216_v53 = vmul.f32 %v1207_v0, %v212_v59  ;;  %v217_v55 = vmul.f32 %v1215_v8, %v213_v58  ;;  %1707 = vst [vmem:[#allocation10_spill] sm:$0xff] %v1350_v15  ;;  %v147_v31 = vadd.f32 %v145_v35, %v1089_v40  ;;  %v1365_v27 = vld [vmem:[%s1676_s1 + $0x160] sm:$0xff]   ;;  %v1374_v35 = vld [vmem:[%s1676_s1 + $0x68] sm:$0xff]  }
  0x27   :  { %1708 = vst [vmem:[#allocation11_spill] sm:$0xff] %v1354_v60  ;;  %1709 = vst [vmem:[#allocation12_spill] sm:$0xff] %v1357_v19  ;;  %v1360_v39 = vmul.f32 2.0, %v1207_v0  ;;  %v1722_v15 = vunpack.c.l.bf16 %v1067_v30  ;;  %v1723_v47 = vunpack.c.l.bf16 %v1074_v33 }
  0x28   :  { %1711 = vst [vmem:[#allocation14_spill] sm:$0xff] %v1365_v27  ;;  %v654_v38 = vadd.f32 -1.0, %v216_v53  ;;  %v655_v37 = vadd.f32 -1.0, %v217_v55  ;;  %1712 = vst [vmem:[#allocation15_spill] sm:$0xff] %v1368_v36  ;;  %v1716_v53 = vand.u32 2147483648, %v1250_v49 }
  0x29   :  { %1710 = vst [vmem:[#allocation13_spill] sm:$0xff] %v1360_v39  ;;  %v980_v22 = vpop.eup %979  ;;  %1713 = vst [vmem:[#allocation16_spill] sm:$0xff] %v1374_v35  ;;  %v1725_v39 = vunpack.c.l.bf16 %v1097_v44 }
  0x2a   :  { %v982_v0 = vpop.eup %981  ;;  %v46_v32 = vmul.f32 %v980_v22, %v1250_v49  ;;  %v1381_v8 = vmul.f32 0.5, %v654_v38  ;;  %v1383_v41 = vmul.f32 0.5, %v655_v37 }
  0x2b   :  { %v53_v55 = vmul.f32 %v982_v0, %v1257_v9 }
  0x2c   :  { %1714 = vst [vmem:[#allocation17_spill] sm:$0xff] %v1381_v8  ;;  %1715 = vst [vmem:[#allocation18_spill] sm:$0xff] %v1383_v41  ;;  %v48_v5 = vsel %vm47_vm0, %v1250_v49, %v46_v32  ;;  %v222_v0 = vmul.f32 0.63078314, %v1381_v8  ;;  %v223_v40 = vmul.f32 0.63078314, %v1383_v41 }
  0x2d   :  { %v51_v38 = vsel %vm49_vm1, %v1716_v53, %v48_v5  ;;  %v55_v37 = vsel %vm54_vm2, %v1257_v9, %v53_v55  ;;  %v1719_v55 = vunpack.c.l.bf16 %v1116_v51 }
  0x2e   :  { %v1403_v32 = vsel %vm56_vm3, %v57_v26, %v55_v37  ;;  %v148_v52 = vmul.f32 -0.48860252, %v51_v38  ;;  %v1405_v22 = vmul.f32 3.0, %v51_v38  ;;  %v1407_v42 = vmul.f32 %v212_v59, %v51_v38 }
  0x2f   :  { %v149_v49 = vmul.f32 -0.48860252, %v1403_v32  ;;  %v1411_v5 = vmul.f32 3.0, %v1403_v32  ;;  %v1414_v53 = vmul.f32 %v213_v58, %v1403_v32  ;;  %v229_v2 = vmul.f32 %v1719_v55, %v222_v0 }
  0x30   :  { %1717 = vst [vmem:[#allocation19_spill] sm:$0xff] %v1405_v22  ;;  %v150_v9 = vmul.f32 %v148_v52, %v1210_v4  ;;  %v179_v26 = vmul.f32 %v148_v52, %v1212_v24  ;;  %v1421_v37 = vmul.f32 %v1405_v22, %v51_v38  ;;  %v1720_v59 = vunpack.c.h.bf16 %v1116_v51 }
  0x31   :  { %1718 = vst [vmem:[#allocation20_spill] sm:$0xff] %v1411_v5  ;;  %v151_v61 = vmul.f32 %v149_v49, %v1217_v7  ;;  %v180_v35 = vmul.f32 %v149_v49, %v1219_v6  ;;  %v1429_v58 = vmul.f32 %v1411_v5, %v1403_v32  ;;  %v1721_v55 = vunpack.c.l.bf16 %v1125_v56 }
  0x32   :  { %v230_v17 = vmul.f32 %v1720_v59, %v223_v40  ;;  %v157_v52 = vmul.f32 %v1722_v15, %v150_v9  ;;  %v166_v36 = vmul.f32 %v1723_v47, %v150_v9  ;;  %v1724_v51 = vunpack.c.l.bf16 %v1079_v34 }
  0x33   :  { %v238_v27 = vmul.f32 %v1721_v55, %v222_v0  ;;  %v186_v22 = vmul.f32 %v1725_v39, %v179_v26  ;;  %v1726_v49 = vunpack.c.h.bf16 %v1067_v30  ;;  %v1727_v5 = vunpack.c.h.bf16 %v1074_v33 }
  0x34   :  { %v175_v59 = vmul.f32 %v1724_v51, %v150_v9  ;;  %v1728_v55 = vunpack.c.h.bf16 %v1079_v34  ;;  %v1729_v15 = vunpack.c.h.bf16 %v1097_v44  ;;  %v159_v47 = vadd.f32 %v157_v52, %v1318_v43 }
  0x35   :  { %v158_v41 = vmul.f32 %v1726_v49, %v151_v61  ;;  %v167_v8 = vmul.f32 %v1727_v5, %v151_v61  ;;  %v168_v28 = vadd.f32 %v166_v36, %v1324_v20  ;;  %v1730_v51 = vunpack.c.l.bf16 %v1102_v45 }
  0x36   :  { %v176_v19 = vmul.f32 %v1728_v55, %v151_v61  ;;  %v187_v60 = vmul.f32 %v1729_v15, %v180_v35  ;;  %v177_v9 = vadd.f32 %v175_v59, %v146_v29  ;;  %v1731_v5 = vunpack.c.h.bf16 %v1102_v45 }
  0x37   :  { %v195_v39 = vmul.f32 %v1730_v51, %v179_v26  ;;  %v160_v30 = vadd.f32 %v158_v41, %v1321_v46  ;;  %v169_v49 = vadd.f32 %v167_v8, %v1333_v18  ;;  %v188_v61 = vadd.f32 %v186_v22, %v159_v47 }
  0x38   :  { %v178_v33 = vadd.f32 %v176_v19, %v147_v31  ;;  %v196_v34 = vmul.f32 %v1731_v5, %v180_v35  ;;  %v1732_v44 = vunpack.c.l.bf16 %v1111_v50  ;;  %v1733_v43 = vunpack.c.h.bf16 %v1111_v50 }
  0x39   :  { %v197_v55 = vadd.f32 %v195_v39, %v168_v28  ;;  %v189_v36 = vadd.f32 %v187_v60, %v160_v30  ;;  %v1734_v52 = vunpack.c.h.bf16 %v1125_v56  ;;  %v1735_v41 = vunpack.c.l.bf16 %v1130_v57 }
  0x3a   :  { %v204_v15 = vmul.f32 %v1732_v44, %v179_v26  ;;  %v205_v20 = vmul.f32 %v1733_v43, %v180_v35  ;;  %v198_v29 = vadd.f32 %v196_v34, %v169_v49  ;;  %v231_v45 = vadd.f32 %v229_v2, %v188_v61 }
  0x3b   :  { %v239_v59 = vmul.f32 %v1734_v52, %v223_v40  ;;  %v247_v46 = vmul.f32 %v1735_v41, %v222_v0  ;;  %v240_v19 = vadd.f32 %v238_v27, %v197_v55  ;;  %v232_v8 = vadd.f32 %v230_v17, %v189_v36 }
  0x3c   :  { %v206_v18 = vadd.f32 %v204_v15, %v177_v9  ;;  %v207_v31 = vadd.f32 %v205_v20, %v178_v33  ;;  %v1736_v22 = vunpack.c.h.bf16 %v1130_v57  ;;  %v251_v50 = vmul.f32 -0.3641828, %v1407_v42 }
  0x3d   :  { %v241_v28 = vadd.f32 %v239_v59, %v198_v29  ;;  %v252_v60 = vmul.f32 -0.3641828, %v1414_v53  ;;  %v311_v56 = vmul.f32 0.1820914, %v1421_v37  ;;  %v312_v47 = vmul.f32 0.1820914, %v1429_v58 }
  0x3e   :  { %v248_v26 = vmul.f32 %v1736_v22, %v223_v40  ;;  %v249_v35 = vadd.f32 %v247_v46, %v206_v18  ;;  %v253_v0 = vmul.f32 %v251_v50, %v1210_v4  ;;  %v282_v2 = vmul.f32 %v251_v50, %v1212_v24 }
  0x3f   :  { %v371_v27 = vmul.f32 5.0, %v51_v38  ;;  %v254_v17 = vmul.f32 %v252_v60, %v1217_v7  ;;  %v283_v57 = vmul.f32 %v252_v60, %v1219_v6  ;;  %v313_v40 = vmul.f32 %v311_v56, %v1252_v13 }
  0x40   :  { %v250_v51 = vadd.f32 %v248_v26, %v207_v31  ;;  %v314_v9 = vmul.f32 %v312_v47, %v1254_v12  ;;  %v1737_v39 = vunpack.c.l.bf16 %v1139_v62  ;;  %v1738_v49 = vunpack.c.l.bf16 %v1144_v63 }
  0x41   :  { %v1739_v5 = vunpack.c.l.bf16 %v1153_v10  ;;  %v1740_v61 = vunpack.c.l.bf16 %v1158_v11  ;;  %v1741_v55 = vunpack.c.h.bf16 %v1139_v62  ;;  %v1742_v15 = vunpack.c.h.bf16 %v1144_v63 }
  0x42   :  { %v260_v30 = vmul.f32 %v1737_v39, %v253_v0  ;;  %v269_v33 = vmul.f32 %v1738_v49, %v253_v0  ;;  %v1743_v20 = vunpack.c.h.bf16 %v1153_v10  ;;  %v1744_v29 = vunpack.c.h.bf16 %v1158_v11 }
  0x43   :  { %v278_v34 = vmul.f32 %v1739_v5, %v253_v0  ;;  %v289_v38 = vmul.f32 %v1740_v61, %v282_v2  ;;  %v261_v44 = vmul.f32 %v1741_v55, %v254_v17  ;;  %v270_v43 = vmul.f32 %v1742_v15, %v254_v17 }
  0x44   :  { %v279_v36 = vmul.f32 %v1743_v20, %v254_v17  ;;  %v290_v52 = vmul.f32 %v1744_v29, %v283_v57  ;;  %v262_v59 = vadd.f32 %v260_v30, %v231_v45  ;;  %v271_v41 = vadd.f32 %v269_v33, %v240_v19 }
  0x45   :  { %v280_v46 = vadd.f32 %v278_v34, %v249_v35  ;;  %v1745_v18 = vunpack.c.l.bf16 %v1167_v16  ;;  %v263_v22 = vadd.f32 %v261_v44, %v232_v8  ;;  %v272_v26 = vadd.f32 %v270_v43, %v241_v28 }
  0x46   :  { %v281_v50 = vadd.f32 %v279_v36, %v250_v51  ;;  %v1746_v62 = vunpack.c.h.bf16 %v1167_v16  ;;  %v291_v63 = vadd.f32 %v289_v38, %v262_v59  ;;  %v1747_v10 = vunpack.c.l.bf16 %v1176_v21 }
  0x47   :  { %v298_v31 = vmul.f32 %v1745_v18, %v282_v2  ;;  %v1748_v11 = vunpack.c.h.bf16 %v1176_v21  ;;  %v292_v45 = vadd.f32 %v290_v52, %v263_v22  ;;  %v1749_v35 = vunpack.c.l.bf16 %v1191_v23  ;;  %v1512_v21 = vld [vmem:[%s1676_s1 + $0xe8] sm:$0xff]  }
  0x48   :  { %v299_v60 = vmul.f32 %v1746_v62, %v283_v57  ;;  %v307_v17 = vmul.f32 %v1747_v10, %v282_v2  ;;  %v1750_v8 = vunpack.c.h.bf16 %v1191_v23  ;;  %v1751_v16 = vunpack.c.l.bf16 %v1203_v14  ;;  %v1762_v62 = vld [vmem:[#allocation11_spill] sm:$0xff] }
  0x49   :  { %v300_v0 = vadd.f32 %v298_v31, %v271_v41  ;;  %v308_v39 = vmul.f32 %v1748_v11, %v283_v57  ;;  %v320_v30 = vmul.f32 %v1749_v35, %v313_v40  ;;  %v1752_v5 = vunpack.c.h.bf16 %v1203_v14  ;;  %v1764_v35 = vld [vmem:[#allocation17_spill] sm:$0xff] }
  0x4a   :  { %v301_v19 = vadd.f32 %v299_v60, %v272_v26  ;;  %v321_v28 = vmul.f32 %v1750_v8, %v314_v9  ;;  %v309_v51 = vadd.f32 %v307_v17, %v280_v46  ;;  %v329_v33 = vmul.f32 %v1751_v16, %v313_v40  ;;  %v1547_v17 = vld [vmem:[%s1676_s1 + $0x58] sm:$0xff]   ;;  %v1765_v8 = vld [vmem:[#allocation18_spill] sm:$0xff]  ;;  %v1766_v16 = vld [vmem:[#allocation19_spill] sm:$0xff] }
  0x4b   :  { %v310_v49 = vadd.f32 %v308_v39, %v281_v50  ;;  %v330_v34 = vmul.f32 %v1752_v5, %v314_v9  ;;  %v322_v2 = vadd.f32 %v320_v30, %v291_v63  ;;  %v1753_v61 = vunpack.c.l.bf16 %v1232_v1 }
  0x4c   :  { %v323_v57 = vadd.f32 %v321_v28, %v292_v45  ;;  %v1754_v23 = vunpack.c.h.bf16 %v1232_v1  ;;  %v331_v44 = vadd.f32 %v329_v33, %v300_v0  ;;  %v342_v43 = vmul.f32 %v311_v56, %v1259_v48 }
  0x4d   :  { %v338_v38 = vmul.f32 %v1753_v61, %v313_v40  ;;  %v332_v15 = vadd.f32 %v330_v34, %v301_v19  ;;  %v343_v14 = vmul.f32 %v312_v47, %v1261_v54  ;;  %v1521_v29 = vmul.f32 5.0, %v1403_v32  ;;  %v1759_v47 = vld [vmem:[#allocation7_spill] sm:$0xff]  ;;  %v1768_v61 = vld [vmem:[#allocation13_spill] sm:$0xff] }
  0x4e   :  { %v339_v55 = vmul.f32 %v1754_v23, %v314_v9  ;;  %v858_v52 = vunpack.c.l.bf16 %v1512_v21  ;;  %v1755_v59 = vunpack.c.l.bf16 %v1237_v3  ;;  %v1756_v40 = vunpack.c.h.bf16 %v1237_v3  ;;  %v1769_v23 = vld [vmem:[#allocation15_spill] sm:$0xff] }
  0x4f   :  { %v340_v20 = vadd.f32 %v338_v38, %v309_v51  ;;  %v1757_v9 = vunpack.c.l.bf16 %v1308_v25  ;;  %v1758_v56 = vunpack.c.h.bf16 %v1308_v25  ;;  %v1760_v31 = vunpack.c.l.bf16 %v1759_v47  ;;  %v955_v25 = vld [vmem:[%s1676_s1 + $0x168] sm:$0xff]  }
  0x50   :  { %v341_v36 = vadd.f32 %v339_v55, %v310_v49  ;;  %v349_v41 = vmul.f32 %v1755_v59, %v342_v43  ;;  %v350_v1 = vmul.f32 %v1756_v40, %v343_v14  ;;  %v1761_v32 = vunpack.c.h.bf16 %v1759_v47  ;;  %v1563_v49 = vld [vmem:[%s1676_s1 + $0xd8] sm:$0xff]  }
  0x51   :  { %v358_v46 = vmul.f32 %v1757_v9, %v342_v43  ;;  %v359_v18 = vmul.f32 %v1758_v56, %v343_v14  ;;  %v367_v22 = vmul.f32 %v1760_v31, %v342_v43  ;;  %v1537_v50 = vmul.f32 %v371_v27, %v1421_v37  ;;  %v1763_v27 = vld [vmem:[#allocation12_spill] sm:$0xff] }
  0x52   :  { %v368_v26 = vmul.f32 %v1761_v32, %v343_v14  ;;  %v377_v60 = vmul.f32 %v1762_v62, %v1421_v37  ;;  %v351_v3 = vadd.f32 %v349_v41, %v322_v2  ;;  %v352_v63 = vadd.f32 %v350_v1, %v323_v57  ;;  %v1767_v2 = vld [vmem:[#allocation20_spill] sm:$0xff] }
  0x53   :  { %v360_v0 = vadd.f32 %v358_v46, %v331_v44  ;;  %v361_v10 = vadd.f32 %v359_v18, %v332_v15  ;;  %v369_v11 = vadd.f32 %v367_v22, %v340_v20  ;;  %v378_v45 = vmul.f32 %v1763_v27, %v1429_v58  ;;  %v959_v15 = vld [vmem:[%s1676_s1 + $0x70] sm:$0xff]  }
  0x54   :  { %v370_v39 = vadd.f32 %v368_v26, %v341_v36  ;;  %v379_v37 = vmul.f32 %v1762_v62, %v1407_v42  ;;  %v380_v19 = vmul.f32 %v1763_v27, %v1414_v53  ;;  %v385_v30 = vmul.f32 %v1762_v62, %v1764_v35  ;;  %v1568_v42 = vld [vmem:[%s1676_s1 + $0x158] sm:$0xff]   ;;  %v1773_v35 = vld [vmem:[#allocation10_spill] sm:$0xff] }
  0x55   :  { %v386_v28 = vmul.f32 %v1763_v27, %v1765_v8  ;;  %v859_v51 = vunpack.c.h.bf16 %v1512_v21  ;;  %v862_v33 = vunpack.c.l.bf16 %v955_v25  ;;  %v863_v5 = vunpack.c.h.bf16 %v955_v25  ;;  %v1770_v27 = vld [vmem:[#allocation9_spill] sm:$0xff] }
  0x56   :  { %v381_v53 = vsub.f32 %v379_v37, %v1766_v16  ;;  %v866_v34 = vunpack.c.l.bf16 %v1547_v17  ;;  %v382_v57 = vsub.f32 %v380_v19, %v1767_v2  ;;  %v389_v38 = vsub.f32 %v385_v30, %v1768_v61 }
  0x57   :  { %v390_v55 = vsub.f32 %v386_v28, %v1769_v23  ;;  %v867_v44 = vunpack.c.h.bf16 %v1547_v17  ;;  %v870_v14 = vunpack.c.l.bf16 %v1563_v49  ;;  %v871_v20 = vunpack.c.h.bf16 %v1563_v49 }
  0x58   :  { %v383_v43 = vmul.f32 0.5, %v381_v53  ;;  %v874_v36 = vunpack.c.l.bf16 %v1568_v42  ;;  %v384_v59 = vmul.f32 0.5, %v382_v57  ;;  %v391_v41 = vmul.f32 0.33333334, %v389_v38  ;;  %v1779_v53 = vld [vmem:[#allocation16_spill] sm:$0xff] }
  0x59   :  { %v392_v40 = vmul.f32 0.33333334, %v390_v55  ;;  %v875_v1 = vunpack.c.h.bf16 %v1568_v42  ;;  %v482_v46 = vmul.f32 0.09635372, %v377_v60  ;;  %v1583_v56 = vmul.f32 0.09635372, %v378_v45 }
  0x5a   :  { %v422_v9 = vmul.f32 -0.3046972, %v383_v43  ;;  %v878_v18 = vunpack.c.l.bf16 %v959_v15  ;;  %v393_v47 = vmul.f32 0.7463527, %v391_v41  ;;  %v423_v22 = vmul.f32 -0.3046972, %v384_v59 }
  0x5b   :  { %v394_v31 = vmul.f32 0.7463527, %v392_v40  ;;  %v879_v32 = vunpack.c.h.bf16 %v959_v15  ;;  %v484_v25 = vmul.f32 %v482_v46, %v1252_v13  ;;  %v485_v17 = vmul.f32 %v1583_v56, %v1254_v12 }
  0x5c   :  { %v424_v26 = vmul.f32 %v422_v9, %v1210_v4  ;;  %v453_v62 = vmul.f32 %v422_v9, %v1212_v24  ;;  %v1771_v37 = vunpack.c.l.bf16 %v1770_v27  ;;  %v1772_v60 = vunpack.c.h.bf16 %v1770_v27  ;;  %v1776_v4 = vld [vmem:[#allocation14_spill] sm:$0xff] }
  0x5d   :  { %v1774_v30 = vunpack.c.l.bf16 %v1773_v35  ;;  %v1775_v28 = vunpack.c.h.bf16 %v1773_v35  ;;  %v1777_v42 = vunpack.c.l.bf16 %v1776_v4  ;;  %v1778_v13 = vunpack.c.h.bf16 %v1776_v4 }
  0x5e   :  { %v400_v19 = vmul.f32 %v1771_v37, %v393_v47  ;;  %v401_v45 = vmul.f32 %v1772_v60, %v394_v31  ;;  %v425_v12 = vmul.f32 %v423_v22, %v1217_v7  ;;  %v1780_v2 = vunpack.c.l.bf16 %v1779_v53 }
  0x5f   :  { %v409_v8 = vmul.f32 %v1774_v30, %v393_v47  ;;  %v410_v49 = vmul.f32 %v1775_v28, %v394_v31  ;;  %v418_v24 = vmul.f32 %v1777_v42, %v393_v47  ;;  %v419_v16 = vmul.f32 %v1778_v13, %v394_v31  ;;  %v964_v42 = vld [vmem:[%s1676_s1 + $0x150] sm:$0xff]  }
  0x60   :  { %v431_v57 = vmul.f32 %v1780_v2, %v424_v26  ;;  %v402_v61 = vadd.f32 %v400_v19, %v351_v3  ;;  %v403_v38 = vadd.f32 %v401_v45, %v352_v63  ;;  %v1781_v59 = vunpack.c.h.bf16 %v1779_v53 }
  0x61   :  { %v411_v23 = vadd.f32 %v409_v8, %v360_v0  ;;  %v412_v55 = vadd.f32 %v410_v49, %v361_v10  ;;  %v420_v15 = vadd.f32 %v418_v24, %v369_v11  ;;  %v421_v43 = vadd.f32 %v419_v16, %v370_v39  ;;  %v960_v39 = vld [vmem:[%s1676_s1 + $0xf0] sm:$0xff]  }
  0x62   :  { %v432_v41 = vmul.f32 %v1781_v59, %v425_v12  ;;  %v440_v40 = vmul.f32 %v858_v52, %v424_v26  ;;  %v433_v9 = vadd.f32 %v431_v57, %v402_v61  ;;  %v441_v47 = vmul.f32 %v859_v51, %v425_v12  ;;  %v961_v51 = vld [vmem:[%s1676_s1 + $0x170] sm:$0xff]  }
  0x63   :  { %v449_v31 = vmul.f32 %v862_v33, %v424_v26  ;;  %v450_v27 = vmul.f32 %v863_v5, %v425_v12  ;;  %v454_v60 = vmul.f32 %v423_v22, %v1219_v6  ;;  %v460_v3 = vmul.f32 %v866_v34, %v453_v62  ;;  %v963_v8 = vld [vmem:[%s1676_s1 + $0xd0] sm:$0xff]  }
  0x64   :  { %v434_v7 = vadd.f32 %v432_v41, %v403_v38  ;;  %v442_v37 = vadd.f32 %v440_v40, %v411_v23  ;;  %v443_v63 = vadd.f32 %v441_v47, %v412_v55  ;;  %v469_v11 = vmul.f32 %v870_v14, %v453_v62 }
  0x65   :  { %v451_v0 = vadd.f32 %v449_v31, %v420_v15  ;;  %v452_v10 = vadd.f32 %v450_v27, %v421_v43  ;;  %v461_v19 = vmul.f32 %v867_v44, %v454_v60  ;;  %v462_v21 = vadd.f32 %v460_v3, %v433_v9  ;;  %v962_v44 = vld [vmem:[%s1676_s1 + $0x50] sm:$0xff]   ;;  %v967_v9 = vld [vmem:[%s1676_s1 + $0x178] sm:$0xff]   ;;  %v1782_v27 = vld [vmem:[#allocation2_spill] sm:$0xff] }
  0x66   :  { %v470_v52 = vmul.f32 %v871_v20, %v454_v60  ;;  %v478_v45 = vmul.f32 %v874_v36, %v453_v62  ;;  %v374_v6 = vmul.f32 %v1521_v29, %v1429_v58  ;;  %v471_v33 = vadd.f32 %v469_v11, %v442_v37 }
  0x67   :  { %v479_v5 = vmul.f32 %v875_v1, %v454_v60  ;;  %v491_v34 = vmul.f32 %v878_v18, %v484_v25  ;;  %v463_v22 = vadd.f32 %v461_v19, %v434_v7  ;;  %v492_v26 = vmul.f32 %v879_v32, %v485_v17  ;;  %v1783_v7 = vld [vmem:[#allocation4_spill] sm:$0xff] }
  0x68   :  { %v472_v14 = vadd.f32 %v470_v52, %v443_v63  ;;  %v882_v35 = vunpack.c.l.bf16 %v960_v39  ;;  %v480_v20 = vadd.f32 %v478_v45, %v451_v0  ;;  %v883_v62 = vunpack.c.h.bf16 %v960_v39  ;;  %v1785_v63 = vld [vmem:[#allocation3_spill] sm:$0xff]  ;;  %v1786_v0 = vld [vmem:[#allocation5_spill] sm:$0xff] }
  0x69   :  { %v481_v36 = vadd.f32 %v479_v5, %v452_v10  ;;  %v886_v30 = vunpack.c.l.bf16 %v961_v51  ;;  %v493_v58 = vadd.f32 %v491_v34, %v462_v21  ;;  %v887_v1 = vunpack.c.h.bf16 %v961_v51 }
  0x6a   :  { %v500_v29 = vmul.f32 %v882_v35, %v484_v25  ;;  %v513_v18 = vmul.f32 %v482_v46, %v1259_v48  ;;  %v501_v28 = vmul.f32 %v883_v62, %v485_v17  ;;  %v514_v49 = vmul.f32 %v1583_v56, %v1261_v54  ;;  %v965_v54 = vld [vmem:[%s1676_s1 + $0x78] sm:$0xff]  }
  0x6b   :  { %v509_v32 = vmul.f32 %v886_v30, %v484_v25  ;;  %v890_v4 = vunpack.c.l.bf16 %v962_v44  ;;  %v494_v24 = vadd.f32 %v492_v26, %v463_v22  ;;  %v510_v13 = vmul.f32 %v887_v1, %v485_v17  ;;  %v966_v17 = vld [vmem:[%s1676_s1 + $0xf8] sm:$0xff]   ;;  %v1788_v22 = vld [vmem:[#allocation6_spill] sm:$0xff]  ;;  %v969_v26 = vld [vmem:[%s1676_s1 + $0xc8] sm:$0xff]  }
  0x6c   :  { %v891_v16 = vunpack.c.h.bf16 %v962_v44  ;;  %v894_v12 = vunpack.c.l.bf16 %v963_v8  ;;  %v502_v53 = vadd.f32 %v500_v29, %v471_v33  ;;  %v503_v2 = vadd.f32 %v501_v28, %v472_v14  ;;  %v970_v30 = vld [vmem:[%s1676_s1 + $0x148] sm:$0xff]  }
  0x6d   :  { %v520_v57 = vmul.f32 %v890_v4, %v513_v18  ;;  %v895_v61 = vunpack.c.h.bf16 %v963_v8  ;;  %v511_v38 = vadd.f32 %v509_v32, %v480_v20  ;;  %v898_v25 = vunpack.c.l.bf16 %v964_v42 }
  0x6e   :  { %v521_v48 = vmul.f32 %v891_v16, %v514_v49  ;;  %v529_v46 = vmul.f32 %v894_v12, %v513_v18  ;;  %v512_v56 = vadd.f32 %v510_v13, %v481_v36  ;;  %v899_v55 = vunpack.c.h.bf16 %v964_v42  ;;  %v1789_v36 = vld [vmem:[#allocation8_spill] sm:$0xff] }
  0x6f   :  { %v530_v23 = vmul.f32 %v895_v61, %v514_v49  ;;  %v542_v15 = vmul.f32 -0.039336238, %v1537_v50  ;;  %v522_v43 = vadd.f32 %v520_v57, %v493_v58  ;;  %v538_v41 = vmul.f32 %v898_v25, %v513_v18 }
  0x70   :  { %v523_v59 = vadd.f32 %v521_v48, %v494_v24  ;;  %v543_v40 = vmul.f32 -0.039336238, %v374_v6  ;;  %v531_v47 = vadd.f32 %v529_v46, %v502_v53  ;;  %v539_v31 = vmul.f32 %v899_v55, %v514_v49  ;;  %v968_v6 = vld [vmem:[%s1676_s1 + $0x48] sm:$0xff]  }
  0x71   :  { %v1784_v37 = vsub.f32 %v1782_v27, %v1783_v7  ;;  %v902_v3 = vunpack.c.l.bf16 %v965_v54  ;;  %v532_v50 = vadd.f32 %v530_v23, %v503_v2  ;;  %v1787_v10 = vsub.f32 %v1785_v63, %v1786_v0 }
  0x72   :  { %v903_v39 = vunpack.c.h.bf16 %v965_v54  ;;  %v906_v19 = vunpack.c.l.bf16 %v966_v17  ;;  %v540_v21 = vadd.f32 %v538_v41, %v511_v38  ;;  %v907_v45 = vunpack.c.h.bf16 %v966_v17 }
  0x73   :  { %v544_v60 = vmul.f32 %v542_v15, %v1784_v37  ;;  %v545_v11 = vmul.f32 %v543_v40, %v1787_v10  ;;  %v910_v51 = vunpack.c.l.bf16 %v967_v9  ;;  %v911_v34 = vunpack.c.h.bf16 %v967_v9 }
  0x74   :  { %v573_v14 = vmul.f32 %v542_v15, %v1788_v22  ;;  %v541_v35 = vadd.f32 %v539_v31, %v512_v56  ;;  %v574_v62 = vmul.f32 %v543_v40, %v1789_v36  ;;  %v914_v1 = vunpack.c.l.bf16 %v968_v6 }
  0x75   :  { %v551_v52 = vmul.f32 %v902_v3, %v544_v60  ;;  %v552_v33 = vmul.f32 %v903_v39, %v545_v11  ;;  %v560_v5 = vmul.f32 %v906_v19, %v544_v60  ;;  %v561_v44 = vmul.f32 %v907_v45, %v545_v11 }
  0x76   :  { %v569_v20 = vmul.f32 %v910_v51, %v544_v60  ;;  %v570_v29 = vmul.f32 %v911_v34, %v545_v11  ;;  %v915_v32 = vunpack.c.h.bf16 %v968_v6  ;;  %v918_v49 = vunpack.c.l.bf16 %v969_v26 }
  0x77   :  { %v553_v8 = vadd.f32 %v551_v52, %v522_v43  ;;  %v554_v58 = vadd.f32 %v552_v33, %v523_v59  ;;  %v562_v18 = vadd.f32 %v560_v5, %v531_v47  ;;  %v563_v28 = vadd.f32 %v561_v44, %v532_v50 }
  0x78   :  { %v571_v4 = vadd.f32 %v569_v20, %v540_v21  ;;  %v580_v42 = vmul.f32 %v914_v1, %v573_v14  ;;  %v919_v24 = vunpack.c.h.bf16 %v969_v26  ;;  %v922_v13 = vunpack.c.l.bf16 %v970_v30 }
  0x79   :  { %v572_v16 = vadd.f32 %v570_v29, %v541_v35  ;;  %v581_v12 = vmul.f32 %v915_v32, %v574_v62  ;;  %v589_v53 = vmul.f32 %v918_v49, %v573_v14  ;;  %v923_v2 = vunpack.c.h.bf16 %v970_v30 }
  0x7a   :  { %v582_v57 = vadd.f32 %v580_v42, %v553_v8  ;;  %v590_v61 = vmul.f32 %v919_v24, %v574_v62  ;;  %v598_v38 = vmul.f32 %v922_v13, %v573_v14 }
  0x7b   :  { %v583_v48 = vadd.f32 %v581_v12, %v554_v58  ;;  %v591_v46 = vadd.f32 %v589_v53, %v562_v18  ;;  %v599_v25 = vmul.f32 %v923_v2, %v574_v62 }
  0x7c   :  { %v592_v54 = vadd.f32 %v590_v61, %v563_v28  ;;  %v600_v56 = vadd.f32 %v598_v38, %v571_v4  ;;  %v602_v23 = vmax.f32 %v582_v57, 0.0 }
  0x7d   :  { %v601_v55 = vadd.f32 %v599_v25, %v572_v16  ;;  %v603_v15 = vmax.f32 %v583_v48, 0.0  ;;  %v608_v17 = vmax.f32 %v591_v46, 0.0 }
  0x7e   :  { %v604_v43 = vmin.f32 %v602_v23, 1.0  ;;  %v609_v59 = vmax.f32 %v592_v54, 0.0  ;;  %v615_v41 = vmax.f32 %v600_v56, 0.0 }
  0x7f   :  { %v605_v40 = vmin.f32 %v603_v15, 1.0  ;;  %v610_v9 = vmin.f32 %v608_v17, 1.0  ;;  %v616_v47 = vmax.f32 %v601_v55, 0.0 }
  0x80   :  { %606 = vst [vmem:[%s1677_s2] sm:$0xff] %v604_v43  ;;  %v611_v31 = vmin.f32 %v609_v59, 1.0  ;;  %v617_v27 = vmin.f32 %v615_v41, 1.0 }
  0x81   :  { %607 = vst [vmem:[%s1677_s2 + $0x8] sm:$0xff] %v605_v40  ;;  %728 = vst [vmem:[%s1677_s2 + $0x10] sm:$0xff] %v610_v9  ;;  %v618_v7 = vmin.f32 %v616_v47, 1.0 }
  0x82   :  { %729 = vst [vmem:[%s1677_s2 + $0x18] sm:$0xff] %v611_v31  ;;  %730 = vst [vmem:[%s1677_s2 + $0x20] sm:$0xff] %v617_v27 }
  0x83   :  { %731 = vst [vmem:[%s1677_s2 + $0x28] sm:$0xff] %v618_v7 }

</bundles_post_ra>
